<compile_context>
chip_gen: v6e
topology: v6e:2x2x1
jax: 0.10.0
libtpu: 0.0.40
codegen_flags: <defaults>
</compile_context>

<pallas_src>
import functools

import jax
import jax.numpy as jnp
import numpy as np
from jax.experimental import pallas as pl
from jax.experimental.pallas import tpu as pltpu

ENC_LAYERS = 16            # conv output channels (enc_layers in the PyTorch module)
DEC_LAYERS = 16            # decoder fc channels (dec_layers)
BN_EPS = 1e-5

CONV_K, CONV_P = 2, 2      # CNN_Encoder: Conv2d(in, 16, kernel_size=2, stride=1, padding=2)
DECONV_K, DECONV_P = 3, 1  # CNN_Decoder: ConvTranspose2d(16, 1, kernel_size=3, stride=1, padding=1)
DEC_H = DEC_W = 5          # decoder output spatial size
LANE = 128                 # TPU lane width; all kernel outputs are padded to this


# -----------------------------------------------------------------------------
# Fused Pallas kernel: encoder + transition + decoder(s) in a single pallas_call
# -----------------------------------------------------------------------------
def _autoencoder_kernel(xp_ref, w8_ref, bc_ref, wl_ref, bl_ref, t_ref,
                        wfc_ref, bfc_ref, wd_ref, bd_ref,
                        z_ref, zt_ref, dec_ref, lat_scr, *, batch, decode_trans):
    """Whole forward in VMEM/vregs; every matmul is a plain 2-D MXU dot.

    xp_ref  : (Ho, M, Wo*C*K*K) bf16  im2col patches, grouped by conv output row oi
    w8_ref  : (Wo*C*K*K, Wo*16) bf16  block-diagonal conv weight (eval-mode BN folded in)
    bc_ref  : (1, Wo*16)        f32   folded conv bias, tiled per oj
    wl_ref  : (Ho, Wo*16, 128)  bf16  encoder Linear, rows permuted to (oi, oj, oc),
                                      output columns zero-padded E -> 128
    bl_ref  : (1, 128)          f32
    t_ref   : (1, 128)          f32   transition_function[action], zero-padded
    wfc_ref : (128, 400)        bf16  decoder fc weight (input rows zero-padded E -> 128)
    bfc_ref : (1, 400)          f32
    wd_ref  : (400, 128)        bf16  ConvTranspose-as-matmul weight, cols zero-padded 25 -> 128
    bd_ref  : (1, 128)          f32
    z_ref   : (M, 128)          f32   encoded latents (cols >= E are zero)
    zt_ref  : (batch, 128)      f32   transitioned latent of the first `batch` rows
    dec_ref : (n_dec*batch, 128) f32  decoded 5x5 images (cols >= 25 are zero)
    lat_scr : VMEM scratch used to stack [z0; z_trans] for the batched decode
    """
    w8 = w8_ref[...]
    bc = bc_ref[...]

    # Encoder: per conv-output-row group g (= oi), conv(+BN)+ReLU then the partial Linear.
    # Unrolled Python loop -> 16 tiny MXU dots; no register reshapes / concats anywhere.
    zacc = None
    for g in range(xp_ref.shape[0]):
        hg = jnp.dot(xp_ref[g], w8, preferred_element_type=jnp.float32) + bc
        hg = jnp.maximum(hg, 0.0)                       # conv + folded BN + ReLU for row g
        part = jnp.dot(hg.astype(jnp.bfloat16), wl_ref[g],
                       preferred_element_type=jnp.float32)
        zacc = part if zacc is None else zacc + part
    z = jnp.maximum(zacc + bl_ref[...], 0.0)            # Linear bias + ReLU (dropout = identity)
    z_ref[...] = z

    z0 = z[:batch]                                       # latents of the input_state rows
    zt = z0 * t_ref[...]                                 # AutoEncoder.transition (VPU, fused)
    zt_ref[...] = zt

    if decode_trans:                                     # options 1/3: decode z0 and zt together
        lat_scr[:batch] = z0
        lat_scr[batch:] = zt
        lat = lat_scr[...]
    else:
        lat = z0

    h2 = jnp.dot(lat.astype(jnp.bfloat16), wfc_ref[...],
                 preferred_element_type=jnp.float32) + bfc_ref[...]
    h2 = jnp.maximum(h2, 0.0)                            # decoder fc + ReLU (dropout = identity)
    dec_ref[...] = jnp.dot(h2.astype(jnp.bfloat16), wd_ref[...],
                           preferred_element_type=jnp.float32) + bd_ref[...]


def _run_fused(prepped, x_patch, t_row, batch, decode_trans):
    m_enc = x_patch.shape[1]
    n_dec = 2 if decode_trans else 1
    kern = functools.partial(_autoencoder_kernel, batch=batch, decode_trans=decode_trans)
    # Gridless (single program): weights (~0.5 MB bf16) + activations fit VMEM on every TPU
    # generation with huge margin -> no BlockSpec tiling / HBM streaming needed.
    return pl.pallas_call(
        kern,
        out_shape=(
            jax.ShapeDtypeStruct((m_enc, LANE), jnp.float32),
            jax.ShapeDtypeStruct((batch, LANE), jnp.float32),
            jax.ShapeDtypeStruct((n_dec * batch, LANE), jnp.float32),
        ),
        scratch_shapes=[pltpu.VMEM((n_dec * batch, LANE), jnp.float32)],
        compiler_params=pltpu.CompilerParams(vmem_limit_bytes=4 * 1024 * 1024),
    )(x_patch, prepped["W8"], prepped["bc"], prepped["Wl"], prepped["bl"], t_row,
      prepped["Wfc"], prepped["bfc"], prepped["Wd"], prepped["bd"])


# -----------------------------------------------------------------------------
# Wrapper-side layout prep (im2col) — fuses into one small XLA fusion under jit
# -----------------------------------------------------------------------------
def _im2col(x):
    """NCHW images -> bf16 im2col patches (Ho, B, Wo*C*K*K), grouped by conv output row oi.

    Column order within a row is (oj, c, kh, kw), matching the block-diagonal conv weight."""
    b, c = x.shape[0], x.shape[1]
    ho = x.shape[2] + 2 * CONV_P - CONV_K + 1
    wo = x.shape[3] + 2 * CONV_P - CONV_K + 1
    xp = jnp.pad(x, ((0, 0), (0, 0), (CONV_P, CONV_P), (CONV_P, CONV_P)))
    taps = [xp[:, :, kh:kh + ho, kw:kw + wo]
            for kh in range(CONV_K) for kw in range(CONV_K)]
    patches = jnp.stack(taps, axis=-1)                    # (B, C, Ho, Wo, K*K)
    patches = patches.transpose(2, 0, 3, 1, 4)            # (Ho, B, Wo, C, K*K)
    return patches.reshape(ho, b, wo * c * CONV_K * CONV_K).astype(jnp.bfloat16)


# -----------------------------------------------------------------------------
# Forward pass mirroring AutoEncoder.forward (eval-mode semantics)
# -----------------------------------------------------------------------------
@functools.partial(jax.jit, static_argnames=("action", "option"))
def autoencoder_forward(prepped, input_state, input_next_state, *, action, option):
    batch = input_state.shape[0]
    emb = prepped["transition"].shape[1]
    npix = DEC_H * DEC_W
    t_row = jnp.zeros((1, LANE), jnp.float32).at[0, :emb].set(prepped["transition"][action])

    if option == 2:
        # Both encoder passes (input_state ++ input_next_state) batched into ONE kernel call.
        xp = _im2col(jnp.concatenate([input_state, input_next_state], axis=0))
        z_all, z_trans, dec = _run_fused(prepped, xp, t_row, batch, decode_trans=False)
        decoded = dec[:, :npix].reshape(batch, 1, DEC_H, DEC_W)
        return decoded, z_trans[:, :emb], z_all[batch:, :emb]

    xp = _im2col(input_state)
    if option in (1, 3):
        z, z_trans, dec = _run_fused(prepped, xp, t_row, batch, decode_trans=True)
        decoded = dec[:batch, :npix].reshape(batch, 1, DEC_H, DEC_W)
        decoded_next = dec[batch:, :npix].reshape(batch, 1, DEC_H, DEC_W)
        if option == 1:
            return decoded, decoded_next
        return decoded, decoded_next, z[:, :emb], z_trans[:, :emb]
    if option == 4:
        _, _, dec = _run_fused(prepped, xp, t_row, batch, decode_trans=False)
        return dec[:, :npix].reshape(batch, 1, DEC_H, DEC_W)
    raise ValueError("unknown option")


# -----------------------------------------------------------------------------
# Parameters: raw PyTorch-layout params + one-time prep into kernel weights
# -----------------------------------------------------------------------------
def init_params(key, in_channels, embedding_dim, flat_conv_dim):
    ks = jax.random.split(key, 12)
    n = lambda k, s, sc=0.1: sc * jax.random.normal(k, s, dtype=jnp.float32)
    return {
        # CNN_Encoder: Conv2d + BatchNorm2d (eval mode: running stats)
        "conv_w": n(ks[0], (ENC_LAYERS, in_channels, CONV_K, CONV_K)),
        "conv_b": n(ks[1], (ENC_LAYERS,)),
        "bn_gamma": 1.0 + 0.1 * jax.random.normal(ks[2], (ENC_LAYERS,), dtype=jnp.float32),
        "bn_beta": 0.1 * jax.random.normal(ks[3], (ENC_LAYERS,), dtype=jnp.float32),
        "bn_mean": 0.1 * jax.random.normal(ks[4], (ENC_LAYERS,), dtype=jnp.float32),
        "bn_var": 1.0 + 0.2 * jax.random.uniform(ks[5], (ENC_LAYERS,), dtype=jnp.float32),
        # Embed.linear: PyTorch layout (out, in)
        "enc_lin_w": n(ks[6], (embedding_dim, flat_conv_dim)),
        "enc_lin_b": n(ks[7], (embedding_dim,)),
        # transition_function: (4, 1, E)
        "transition": n(ks[8], (4, 1, embedding_dim), 0.3),
        # CNN_Decoder
        "dec_fc_w": n(ks[9], (DEC_LAYERS * DEC_H * DEC_W, embedding_dim)),
        "dec_fc_b": n(ks[10], (DEC_LAYERS * DEC_H * DEC_W,)),
        "deconv_w": n(ks[11], (DEC_LAYERS, 1, DECONV_K, DECONV_K)),
        "deconv_b": jnp.full((1,), 0.02, jnp.float32),
    }


def _to_bf16(a):
    return jnp.asarray(np.asarray(a, np.float32)).astype(jnp.bfloat16)


def prepare_params(raw, in_channels, height, width):
    """One-time prep: fold eval-mode BN into the conv, lower conv / ConvTranspose to small dense
    bf16 matmul weights, permute the encoder Linear to the kernel's (oi, oj, oc) feature order
    and zero-pad all output columns to the 128-lane width."""
    ho = height + 2 * CONV_P - CONV_K + 1
    wo = width + 2 * CONV_P - CONV_K + 1
    ckk = in_channels * CONV_K * CONV_K
    oc = ENC_LAYERS

    scale = np.asarray(raw["bn_gamma"]) / np.sqrt(np.asarray(raw["bn_var"]) + BN_EPS)
    w_fold = np.asarray(raw["conv_w"]) * scale[:, None, None, None]          # (16, C, 2, 2)
    b_fold = ((np.asarray(raw["conv_b"]) - np.asarray(raw["bn_mean"])) * scale
              + np.asarray(raw["bn_beta"]))                                  # (16,)

    # Conv as a block-diagonal matmul over one conv-output row: the Wo positions of a row share
    # the same (C*K*K, 16) block.  Patch cols are (oj, c, kh, kw); output cols are (oj, oc).
    blk = w_fold.transpose(1, 2, 3, 0).reshape(ckk, oc)
    w8 = np.zeros((wo * ckk, wo * oc), np.float32)
    for j in range(wo):
        w8[j * ckk:(j + 1) * ckk, j * oc:(j + 1) * oc] = blk
    bc = np.tile(b_fold, wo)[None, :].astype(np.float32)                     # (1, wo*16)

    # Encoder Linear: rows permuted from PyTorch's (oc, oi, oj) flatten order to (oi, oj, oc),
    # split per conv output row oi, output columns zero-padded E -> 128 (lane-dense z).
    emb = int(np.asarray(raw["enc_lin_w"]).shape[0])
    assert emb <= LANE
    wl = np.asarray(raw["enc_lin_w"]).T.reshape(oc, ho, wo, emb)
    wl = wl.transpose(1, 2, 0, 3).reshape(ho, wo * oc, emb)
    wl = np.pad(wl, ((0, 0), (0, 0), (0, LANE - emb))).astype(np.float32)
    bl = np.pad(np.asarray(raw["enc_lin_b"])[None, :],
                ((0, 0), (0, LANE - emb))).astype(np.float32)

    # Decoder fc: (E, 400); input rows zero-padded to 128 to match the padded latent.
    wfc = np.pad(np.asarray(raw["dec_fc_w"]).T, ((0, LANE - emb), (0, 0))).astype(np.float32)
    bfc = np.asarray(raw["dec_fc_b"])[None, :].astype(np.float32)

    # ConvTranspose2d(16, 1, k=3, s=1, p=1) as a matmul:
    #   out[b, 0, i, j] = sum_{dc,ki,kj} h[b, dc, i-ki+p, j-kj+p] * w[dc, 0, ki, kj] + bias
    wdec = np.asarray(raw["deconv_w"])                                       # (16, 1, 3, 3)
    wd = np.zeros((DEC_LAYERS, DEC_H, DEC_W, DEC_H, DEC_W), np.float32)
    for ki in range(DECONV_K):
        for kj in range(DECONV_K):
            for i in range(DEC_H):
                for j in range(DEC_W):
                    ii, jj = i - ki + DECONV_P, j - kj + DECONV_P
                    if 0 <= ii < DEC_H and 0 <= jj < DEC_W:
                        wd[:, ii, jj, i, j] += wdec[:, 0, ki, kj]
    wd = wd.reshape(DEC_LAYERS * DEC_H * DEC_W, DEC_H * DEC_W)
    wd = np.pad(wd, ((0, 0), (0, LANE - DEC_H * DEC_W)))                     # lane-dense output
    bd = np.zeros((1, LANE), np.float32)
    bd[0, :DEC_H * DEC_W] = float(np.asarray(raw["deconv_b"])[0])

    return {
        "W8": _to_bf16(w8), "bc": jnp.asarray(bc),
        "Wl": _to_bf16(wl), "bl": jnp.asarray(bl),
        "Wfc": _to_bf16(wfc), "bfc": jnp.asarray(bfc),
        "Wd": _to_bf16(wd), "bd": jnp.asarray(bd),
        "transition": raw["transition"][:, 0, :],                            # (4, E) f32
    }


# -----------------------------------------------------------------------------
# Plain-JAX reference (direct translation of the PyTorch module, eval mode)
# -----------------------------------------------------------------------------
def _ref_encode(raw, x):
    scale = raw["bn_gamma"] / jnp.sqrt(raw["bn_var"] + BN_EPS)
    w_fold = raw["conv_w"] * scale[:, None, None, None]
    b_fold = (raw["conv_b"] - raw["bn_mean"]) * scale + raw["bn_beta"]
    xp = jnp.pad(x, ((0, 0), (0, 0), (CONV_P, CONV_P), (CONV_P, CONV_P)))
    ho = x.shape[2] + 2 * CONV_P - CONV_K + 1
    wo = x.shape[3] + 2 * CONV_P - CONV_K + 1
    y = jnp.zeros((x.shape[0], ENC_LAYERS, ho, wo), jnp.float32)
    for kh in range(CONV_K):
        for kw in range(CONV_K):
            y = y + jnp.einsum("bchw,oc->bohw",
                               xp[:, :, kh:kh + ho, kw:kw + wo], w_fold[:, :, kh, kw])
    y = jnp.maximum(y + b_fold[None, :, None, None], 0.0)
    flat = y.reshape(x.shape[0], -1)
    return jnp.maximum(flat @ raw["enc_lin_w"].T + raw["enc_lin_b"], 0.0)


def _ref_decode(raw, z):
    h = jnp.maximum(z @ raw["dec_fc_w"].T + raw["dec_fc_b"], 0.0)
    h = h.reshape(z.shape[0], DEC_LAYERS, DEC_H, DEC_W)
    q = DECONV_K - 1 - DECONV_P
    hp = jnp.pad(h, ((0, 0), (0, 0), (q, q), (q, q)))
    y = jnp.zeros((z.shape[0], DEC_H, DEC_W), jnp.float32)
    for ki in range(DECONV_K):
        for kj in range(DECONV_K):
            patch = hp[:, :, DECONV_K - 1 - ki:DECONV_K - 1 - ki + DEC_H,
                       DECONV_K - 1 - kj:DECONV_K - 1 - kj + DEC_W]
            y = y + jnp.einsum("bchw,c->bhw", patch, raw["deconv_w"][:, 0, ki, kj])
    return y[:, None] + raw["deconv_b"][None, :, None, None]


def _bf16_round(a):
    return np.asarray(jnp.asarray(a, jnp.float32).astype(jnp.bfloat16).astype(jnp.float32))


def _quantize_raw_like_kernel(raw):
    """Reference params that carry the kernel's deliberate bf16 weight rounding.  The conv weight
    is rounded AFTER the BN fold (exactly as the kernel does) and then un-folded so the
    reference's own fold reproduces it; all other matmul weights round elementwise."""
    scale = np.asarray(raw["bn_gamma"]) / np.sqrt(np.asarray(raw["bn_var"]) + BN_EPS)
    w_fold_q = _bf16_round(np.asarray(raw["conv_w"]) * scale[:, None, None, None])
    q = dict(raw)
    q["conv_w"] = jnp.asarray(w_fold_q / scale[:, None, None, None])
    q["enc_lin_w"] = jnp.asarray(_bf16_round(raw["enc_lin_w"]))
    q["dec_fc_w"] = jnp.asarray(_bf16_round(raw["dec_fc_w"]))
    q["deconv_w"] = jnp.asarray(_bf16_round(raw["deconv_w"]))
    return q


# -----------------------------------------------------------------------------
# Demo
# -----------------------------------------------------------------------------
if __name__ == "__main__":
    B, C, H, W = 2, 4, 5, 5                      # tensor_shape = (2, 4, 5, 5)
    embedding_dim = 32
    enc_hw = H + 2 * CONV_P - CONV_K + 1         # 8  (matches calculate_flat_conv_dim)
    flat_conv_dim = ENC_LAYERS * enc_hw * enc_hw  # 1024

    key = jax.random.PRNGKey(0)
    k_params, k_x, k_xn = jax.random.split(key, 3)
    raw = init_params(k_params, C, embedding_dim, flat_conv_dim)
    prepped = prepare_params(raw, C, H, W)

    input_state = jax.random.normal(k_x, (B, C, H, W), dtype=jnp.float32)
    input_next_state = jax.random.normal(k_xn, (B, C, H, W), dtype=jnp.float32)
    action = 1

    # Option 3: one fused pallas_call producing (decoded, decoded_next, z, z_trans).
    dec, dec_next, z, z_trans = autoencoder_forward(
        prepped, input_state, input_next_state, action=action, option=3)
    jax.block_until_ready((dec, dec_next, z, z_trans))
    assert dec.shape == (B, 1, DEC_H, DEC_W)
    assert dec_next.shape == (B, 1, DEC_H, DEC_W)
    assert z.shape == (B, embedding_dim)
    assert z_trans.shape == (B, embedding_dim)

    # Reference uses the same bf16-rounded weights / inputs as the kernel (f32 everywhere else),
    # so the remaining diff is only the activation bf16 casts at the MXU operands (few 1e-3) and
    # the tolerance can stay tight.  Vs the pure-f32 PyTorch numbers the extra error is bounded
    # by the deliberate bf16 weight quantization (~0.4% relative).
    raw_q = _quantize_raw_like_kernel(raw)
    x_q = input_state.astype(jnp.bfloat16).astype(jnp.float32)
    xn_q = input_next_state.astype(jnp.bfloat16).astype(jnp.float32)
    z_ref = _ref_encode(raw_q, x_q)
    zt_ref = z_ref * raw["transition"][action, 0]
    dec_ref = _ref_decode(raw_q, z_ref)
    dec_next_ref = _ref_decode(raw_q, zt_ref)
    tol = dict(rtol=2e-2, atol=1e-2)
    np.testing.assert_allclose(np.asarray(z), np.asarray(z_ref), **tol)
    np.testing.assert_allclose(np.asarray(z_trans), np.asarray(zt_ref), **tol)
    np.testing.assert_allclose(np.asarray(dec), np.asarray(dec_ref), **tol)
    np.testing.assert_allclose(np.asarray(dec_next), np.asarray(dec_next_ref), **tol)

    # Option 2: both encoder passes batched into the same single kernel call.
    dec2, z_trans2, z_next2 = autoencoder_forward(
        prepped, input_state, input_next_state, action=action, option=2)
    jax.block_until_ready((dec2, z_trans2, z_next2))
    assert dec2.shape == (B, 1, DEC_H, DEC_W)
    assert z_trans2.shape == (B, embedding_dim)
    assert z_next2.shape == (B, embedding_dim)
    np.testing.assert_allclose(np.asarray(dec2), np.asarray(dec_ref), **tol)
    np.testing.assert_allclose(np.asarray(z_trans2), np.asarray(zt_ref), **tol)
    np.testing.assert_allclose(np.asarray(z_next2),
                               np.asarray(_ref_encode(raw_q, xn_q)), **tol)

    print("KERNEL_OK")
</pallas_src>

<mosaic_0001>
module attributes {stable_mosaic.version = 11 : i64} {
  func.func @_autoencoder_kernel(%arg0: memref<8x2x128xbf16, #tpu.memory_space<vmem>>, %arg1: memref<128x128xbf16, #tpu.memory_space<vmem>>, %arg2: memref<1x128xf32, #tpu.memory_space<vmem>>, %arg3: memref<8x128x128xbf16, #tpu.memory_space<vmem>>, %arg4: memref<1x128xf32, #tpu.memory_space<vmem>>, %arg5: memref<1x128xf32, #tpu.memory_space<vmem>>, %arg6: memref<128x400xbf16, #tpu.memory_space<vmem>>, %arg7: memref<1x400xf32, #tpu.memory_space<vmem>>, %arg8: memref<400x128xbf16, #tpu.memory_space<vmem>>, %arg9: memref<1x128xf32, #tpu.memory_space<vmem>>, %arg10: memref<2x128xf32, #tpu.memory_space<vmem>>, %arg11: memref<2x128xf32, #tpu.memory_space<vmem>>, %arg12: memref<4x128xf32, #tpu.memory_space<vmem>>, %arg13: memref<4x128xf32, #tpu.memory_space<vmem>>) attributes {dimension_semantics = [], scalar_prefetch = 0 : i64, scratch_operands = 1 : i64, tpu.core_type = #tpu.core_type<tc>} {
    %c0 = arith.constant 0 : index
    %c0_0 = arith.constant 0 : index
    %0 = vector.load %arg1[%c0, %c0_0] : memref<128x128xbf16, #tpu.memory_space<vmem>>, vector<128x128xbf16>
    %c0_1 = arith.constant 0 : index
    %c0_2 = arith.constant 0 : index
    %1 = vector.load %arg2[%c0_1, %c0_2] : memref<1x128xf32, #tpu.memory_space<vmem>>, vector<1x128xf32>
    %c0_3 = arith.constant 0 : index
    %c0_4 = arith.constant 0 : index
    %c0_5 = arith.constant 0 : index
    %2 = vector.load %arg0[%c0_3, %c0_4, %c0_5] : memref<8x2x128xbf16, #tpu.memory_space<vmem>>, vector<1x2x128xbf16>
    %3 = vector.shape_cast %2 : vector<1x2x128xbf16> to vector<2x128xbf16>
    %cst = arith.constant dense<0.000000e+00> : vector<2x128xf32>
    %4 = tpu.matmul %3, %0, %cst {dimension_numbers = #tpu.dot_dimension_numbers<[1], [0], [0], [1], [0, 0, 1, 1], [], []>} : vector<2x128xbf16>, vector<128x128xbf16>, vector<2x128xf32> -> vector<2x128xf32>
    %5 = vector.broadcast %1 : vector<1x128xf32> to vector<2x128xf32>
    %6 = arith.addf %4, %5 : vector<2x128xf32>
    %cst_6 = arith.constant 0.000000e+00 : f32
    %7 = vector.broadcast %cst_6 : f32 to vector<2x128xf32>
    %8 = arith.maximumf %6, %7 : vector<2x128xf32>
    %9 = arith.truncf %8 : vector<2x128xf32> to vector<2x128xbf16>
    %c0_7 = arith.constant 0 : index
    %c0_8 = arith.constant 0 : index
    %c0_9 = arith.constant 0 : index
    %10 = vector.load %arg3[%c0_7, %c0_8, %c0_9] : memref<8x128x128xbf16, #tpu.memory_space<vmem>>, vector<1x128x128xbf16>
    %11 = vector.shape_cast %10 : vector<1x128x128xbf16> to vector<128x128xbf16>
    %cst_10 = arith.constant dense<0.000000e+00> : vector<2x128xf32>
    %12 = tpu.matmul %9, %11, %cst_10 {dimension_numbers = #tpu.dot_dimension_numbers<[1], [0], [0], [1], [0, 0, 1, 1], [], []>} : vector<2x128xbf16>, vector<128x128xbf16>, vector<2x128xf32> -> vector<2x128xf32>
    %c1 = arith.constant 1 : index
    %c0_11 = arith.constant 0 : index
    %c0_12 = arith.constant 0 : index
    %13 = vector.load %arg0[%c1, %c0_11, %c0_12] : memref<8x2x128xbf16, #tpu.memory_space<vmem>>, vector<1x2x128xbf16>
    %14 = vector.shape_cast %13 : vector<1x2x128xbf16> to vector<2x128xbf16>
    %cst_13 = arith.constant dense<0.000000e+00> : vector<2x128xf32>
    %15 = tpu.matmul %14, %0, %cst_13 {dimension_numbers = #tpu.dot_dimension_numbers<[1], [0], [0], [1], [0, 0, 1, 1], [], []>} : vector<2x128xbf16>, vector<128x128xbf16>, vector<2x128xf32> -> vector<2x128xf32>
    %16 = vector.broadcast %1 : vector<1x128xf32> to vector<2x128xf32>
    %17 = arith.addf %15, %16 : vector<2x128xf32>
    %cst_14 = arith.constant 0.000000e+00 : f32
    %18 = vector.broadcast %cst_14 : f32 to vector<2x128xf32>
    %19 = arith.maximumf %17, %18 : vector<2x128xf32>
    %20 = arith.truncf %19 : vector<2x128xf32> to vector<2x128xbf16>
    %c1_15 = arith.constant 1 : index
    %c0_16 = arith.constant 0 : index
    %c0_17 = arith.constant 0 : index
    %21 = vector.load %arg3[%c1_15, %c0_16, %c0_17] : memref<8x128x128xbf16, #tpu.memory_space<vmem>>, vector<1x128x128xbf16>
    %22 = vector.shape_cast %21 : vector<1x128x128xbf16> to vector<128x128xbf16>
    %cst_18 = arith.constant dense<0.000000e+00> : vector<2x128xf32>
    %23 = tpu.matmul %20, %22, %cst_18 {dimension_numbers = #tpu.dot_dimension_numbers<[1], [0], [0], [1], [0, 0, 1, 1], [], []>} : vector<2x128xbf16>, vector<128x128xbf16>, vector<2x128xf32> -> vector<2x128xf32>
    %24 = arith.addf %12, %23 : vector<2x128xf32>
    %c2 = arith.constant 2 : index
    %c0_19 = arith.constant 0 : index
    %c0_20 = arith.constant 0 : index
    %25 = vector.load %arg0[%c2, %c0_19, %c0_20] : memref<8x2x128xbf16, #tpu.memory_space<vmem>>, vector<1x2x128xbf16>
    %26 = vector.shape_cast %25 : vector<1x2x128xbf16> to vector<2x128xbf16>
    %cst_21 = arith.constant dense<0.000000e+00> : vector<2x128xf32>
    %27 = tpu.matmul %26, %0, %cst_21 {dimension_numbers = #tpu.dot_dimension_numbers<[1], [0], [0], [1], [0, 0, 1, 1], [], []>} : vector<2x128xbf16>, vector<128x128xbf16>, vector<2x128xf32> -> vector<2x128xf32>
    %28 = vector.broadcast %1 : vector<1x128xf32> to vector<2x128xf32>
    %29 = arith.addf %27, %28 : vector<2x128xf32>
    %cst_22 = arith.constant 0.000000e+00 : f32
    %30 = vector.broadcast %cst_22 : f32 to vector<2x128xf32>
    %31 = arith.maximumf %29, %30 : vector<2x128xf32>
    %32 = arith.truncf %31 : vector<2x128xf32> to vector<2x128xbf16>
    %c2_23 = arith.constant 2 : index
    %c0_24 = arith.constant 0 : index
    %c0_25 = arith.constant 0 : index
    %33 = vector.load %arg3[%c2_23, %c0_24, %c0_25] : memref<8x128x128xbf16, #tpu.memory_space<vmem>>, vector<1x128x128xbf16>
    %34 = vector.shape_cast %33 : vector<1x128x128xbf16> to vector<128x128xbf16>
    %cst_26 = arith.constant dense<0.000000e+00> : vector<2x128xf32>
    %35 = tpu.matmul %32, %34, %cst_26 {dimension_numbers = #tpu.dot_dimension_numbers<[1], [0], [0], [1], [0, 0, 1, 1], [], []>} : vector<2x128xbf16>, vector<128x128xbf16>, vector<2x128xf32> -> vector<2x128xf32>
    %36 = arith.addf %24, %35 : vector<2x128xf32>
    %c3 = arith.constant 3 : index
    %c0_27 = arith.constant 0 : index
    %c0_28 = arith.constant 0 : index
    %37 = vector.load %arg0[%c3, %c0_27, %c0_28] : memref<8x2x128xbf16, #tpu.memory_space<vmem>>, vector<1x2x128xbf16>
    %38 = vector.shape_cast %37 : vector<1x2x128xbf16> to vector<2x128xbf16>
    %cst_29 = arith.constant dense<0.000000e+00> : vector<2x128xf32>
    %39 = tpu.matmul %38, %0, %cst_29 {dimension_numbers = #tpu.dot_dimension_numbers<[1], [0], [0], [1], [0, 0, 1, 1], [], []>} : vector<2x128xbf16>, vector<128x128xbf16>, vector<2x128xf32> -> vector<2x128xf32>
    %40 = vector.broadcast %1 : vector<1x128xf32> to vector<2x128xf32>
    %41 = arith.addf %39, %40 : vector<2x128xf32>
    %cst_30 = arith.constant 0.000000e+00 : f32
    %42 = vector.broadcast %cst_30 : f32 to vector<2x128xf32>
    %43 = arith.maximumf %41, %42 : vector<2x128xf32>
    %44 = arith.truncf %43 : vector<2x128xf32> to vector<2x128xbf16>
    %c3_31 = arith.constant 3 : index
    %c0_32 = arith.constant 0 : index
    %c0_33 = arith.constant 0 : index
    %45 = vector.load %arg3[%c3_31, %c0_32, %c0_33] : memref<8x128x128xbf16, #tpu.memory_space<vmem>>, vector<1x128x128xbf16>
    %46 = vector.shape_cast %45 : vector<1x128x128xbf16> to vector<128x128xbf16>
    %cst_34 = arith.constant dense<0.000000e+00> : vector<2x128xf32>
    %47 = tpu.matmul %44, %46, %cst_34 {dimension_numbers = #tpu.dot_dimension_numbers<[1], [0], [0], [1], [0, 0, 1, 1], [], []>} : vector<2x128xbf16>, vector<128x128xbf16>, vector<2x128xf32> -> vector<2x128xf32>
    %48 = arith.addf %36, %47 : vector<2x128xf32>
    %c4 = arith.constant 4 : index
    %c0_35 = arith.constant 0 : index
    %c0_36 = arith.constant 0 : index
    %49 = vector.load %arg0[%c4, %c0_35, %c0_36] : memref<8x2x128xbf16, #tpu.memory_space<vmem>>, vector<1x2x128xbf16>
    %50 = vector.shape_cast %49 : vector<1x2x128xbf16> to vector<2x128xbf16>
    %cst_37 = arith.constant dense<0.000000e+00> : vector<2x128xf32>
    %51 = tpu.matmul %50, %0, %cst_37 {dimension_numbers = #tpu.dot_dimension_numbers<[1], [0], [0], [1], [0, 0, 1, 1], [], []>} : vector<2x128xbf16>, vector<128x128xbf16>, vector<2x128xf32> -> vector<2x128xf32>
    %52 = vector.broadcast %1 : vector<1x128xf32> to vector<2x128xf32>
    %53 = arith.addf %51, %52 : vector<2x128xf32>
    %cst_38 = arith.constant 0.000000e+00 : f32
    %54 = vector.broadcast %cst_38 : f32 to vector<2x128xf32>
    %55 = arith.maximumf %53, %54 : vector<2x128xf32>
    %56 = arith.truncf %55 : vector<2x128xf32> to vector<2x128xbf16>
    %c4_39 = arith.constant 4 : index
    %c0_40 = arith.constant 0 : index
    %c0_41 = arith.constant 0 : index
    %57 = vector.load %arg3[%c4_39, %c0_40, %c0_41] : memref<8x128x128xbf16, #tpu.memory_space<vmem>>, vector<1x128x128xbf16>
    %58 = vector.shape_cast %57 : vector<1x128x128xbf16> to vector<128x128xbf16>
    %cst_42 = arith.constant dense<0.000000e+00> : vector<2x128xf32>
    %59 = tpu.matmul %56, %58, %cst_42 {dimension_numbers = #tpu.dot_dimension_numbers<[1], [0], [0], [1], [0, 0, 1, 1], [], []>} : vector<2x128xbf16>, vector<128x128xbf16>, vector<2x128xf32> -> vector<2x128xf32>
    %60 = arith.addf %48, %59 : vector<2x128xf32>
    %c5 = arith.constant 5 : index
    %c0_43 = arith.constant 0 : index
    %c0_44 = arith.constant 0 : index
    %61 = vector.load %arg0[%c5, %c0_43, %c0_44] : memref<8x2x128xbf16, #tpu.memory_space<vmem>>, vector<1x2x128xbf16>
    %62 = vector.shape_cast %61 : vector<1x2x128xbf16> to vector<2x128xbf16>
    %cst_45 = arith.constant dense<0.000000e+00> : vector<2x128xf32>
    %63 = tpu.matmul %62, %0, %cst_45 {dimension_numbers = #tpu.dot_dimension_numbers<[1], [0], [0], [1], [0, 0, 1, 1], [], []>} : vector<2x128xbf16>, vector<128x128xbf16>, vector<2x128xf32> -> vector<2x128xf32>
    %64 = vector.broadcast %1 : vector<1x128xf32> to vector<2x128xf32>
    %65 = arith.addf %63, %64 : vector<2x128xf32>
    %cst_46 = arith.constant 0.000000e+00 : f32
    %66 = vector.broadcast %cst_46 : f32 to vector<2x128xf32>
    %67 = arith.maximumf %65, %66 : vector<2x128xf32>
    %68 = arith.truncf %67 : vector<2x128xf32> to vector<2x128xbf16>
    %c5_47 = arith.constant 5 : index
    %c0_48 = arith.constant 0 : index
    %c0_49 = arith.constant 0 : index
    %69 = vector.load %arg3[%c5_47, %c0_48, %c0_49] : memref<8x128x128xbf16, #tpu.memory_space<vmem>>, vector<1x128x128xbf16>
    %70 = vector.shape_cast %69 : vector<1x128x128xbf16> to vector<128x128xbf16>
    %cst_50 = arith.constant dense<0.000000e+00> : vector<2x128xf32>
    %71 = tpu.matmul %68, %70, %cst_50 {dimension_numbers = #tpu.dot_dimension_numbers<[1], [0], [0], [1], [0, 0, 1, 1], [], []>} : vector<2x128xbf16>, vector<128x128xbf16>, vector<2x128xf32> -> vector<2x128xf32>
    %72 = arith.addf %60, %71 : vector<2x128xf32>
    %c6 = arith.constant 6 : index
    %c0_51 = arith.constant 0 : index
    %c0_52 = arith.constant 0 : index
    %73 = vector.load %arg0[%c6, %c0_51, %c0_52] : memref<8x2x128xbf16, #tpu.memory_space<vmem>>, vector<1x2x128xbf16>
    %74 = vector.shape_cast %73 : vector<1x2x128xbf16> to vector<2x128xbf16>
    %cst_53 = arith.constant dense<0.000000e+00> : vector<2x128xf32>
    %75 = tpu.matmul %74, %0, %cst_53 {dimension_numbers = #tpu.dot_dimension_numbers<[1], [0], [0], [1], [0, 0, 1, 1], [], []>} : vector<2x128xbf16>, vector<128x128xbf16>, vector<2x128xf32> -> vector<2x128xf32>
    %76 = vector.broadcast %1 : vector<1x128xf32> to vector<2x128xf32>
    %77 = arith.addf %75, %76 : vector<2x128xf32>
    %cst_54 = arith.constant 0.000000e+00 : f32
    %78 = vector.broadcast %cst_54 : f32 to vector<2x128xf32>
    %79 = arith.maximumf %77, %78 : vector<2x128xf32>
    %80 = arith.truncf %79 : vector<2x128xf32> to vector<2x128xbf16>
    %c6_55 = arith.constant 6 : index
    %c0_56 = arith.constant 0 : index
    %c0_57 = arith.constant 0 : index
    %81 = vector.load %arg3[%c6_55, %c0_56, %c0_57] : memref<8x128x128xbf16, #tpu.memory_space<vmem>>, vector<1x128x128xbf16>
    %82 = vector.shape_cast %81 : vector<1x128x128xbf16> to vector<128x128xbf16>
    %cst_58 = arith.constant dense<0.000000e+00> : vector<2x128xf32>
    %83 = tpu.matmul %80, %82, %cst_58 {dimension_numbers = #tpu.dot_dimension_numbers<[1], [0], [0], [1], [0, 0, 1, 1], [], []>} : vector<2x128xbf16>, vector<128x128xbf16>, vector<2x128xf32> -> vector<2x128xf32>
    %84 = arith.addf %72, %83 : vector<2x128xf32>
    %c7 = arith.constant 7 : index
    %c0_59 = arith.constant 0 : index
    %c0_60 = arith.constant 0 : index
    %85 = vector.load %arg0[%c7, %c0_59, %c0_60] : memref<8x2x128xbf16, #tpu.memory_space<vmem>>, vector<1x2x128xbf16>
    %86 = vector.shape_cast %85 : vector<1x2x128xbf16> to vector<2x128xbf16>
    %cst_61 = arith.constant dense<0.000000e+00> : vector<2x128xf32>
    %87 = tpu.matmul %86, %0, %cst_61 {dimension_numbers = #tpu.dot_dimension_numbers<[1], [0], [0], [1], [0, 0, 1, 1], [], []>} : vector<2x128xbf16>, vector<128x128xbf16>, vector<2x128xf32> -> vector<2x128xf32>
    %88 = vector.broadcast %1 : vector<1x128xf32> to vector<2x128xf32>
    %89 = arith.addf %87, %88 : vector<2x128xf32>
    %cst_62 = arith.constant 0.000000e+00 : f32
    %90 = vector.broadcast %cst_62 : f32 to vector<2x128xf32>
    %91 = arith.maximumf %89, %90 : vector<2x128xf32>
    %92 = arith.truncf %91 : vector<2x128xf32> to vector<2x128xbf16>
    %c7_63 = arith.constant 7 : index
    %c0_64 = arith.constant 0 : index
    %c0_65 = arith.constant 0 : index
    %93 = vector.load %arg3[%c7_63, %c0_64, %c0_65] : memref<8x128x128xbf16, #tpu.memory_space<vmem>>, vector<1x128x128xbf16>
    %94 = vector.shape_cast %93 : vector<1x128x128xbf16> to vector<128x128xbf16>
    %cst_66 = arith.constant dense<0.000000e+00> : vector<2x128xf32>
    %95 = tpu.matmul %92, %94, %cst_66 {dimension_numbers = #tpu.dot_dimension_numbers<[1], [0], [0], [1], [0, 0, 1, 1], [], []>} : vector<2x128xbf16>, vector<128x128xbf16>, vector<2x128xf32> -> vector<2x128xf32>
    %96 = arith.addf %84, %95 : vector<2x128xf32>
    %c0_67 = arith.constant 0 : index
    %c0_68 = arith.constant 0 : index
    %97 = vector.load %arg4[%c0_67, %c0_68] : memref<1x128xf32, #tpu.memory_space<vmem>>, vector<1x128xf32>
    %98 = vector.broadcast %97 : vector<1x128xf32> to vector<2x128xf32>
    %99 = arith.addf %96, %98 : vector<2x128xf32>
    %cst_69 = arith.constant 0.000000e+00 : f32
    %100 = vector.broadcast %cst_69 : f32 to vector<2x128xf32>
    %101 = arith.maximumf %99, %100 : vector<2x128xf32>
    %c0_70 = arith.constant 0 : index
    %c0_71 = arith.constant 0 : index
    %102 = vector.load %arg10[%c0_70, %c0_71] : memref<2x128xf32, #tpu.memory_space<vmem>>, vector<2x128xf32>
    tpu.vector_store %arg10[%c0_70, %c0_71], %101 {strides = array<i32>} : memref<2x128xf32, #tpu.memory_space<vmem>>, vector<2x128xf32>,
    %c0_72 = arith.constant 0 : index
    %c0_73 = arith.constant 0 : index
    %103 = vector.load %arg5[%c0_72, %c0_73] : memref<1x128xf32, #tpu.memory_space<vmem>>, vector<1x128xf32>
    %104 = vector.broadcast %103 : vector<1x128xf32> to vector<2x128xf32>
    %105 = arith.mulf %101, %104 : vector<2x128xf32>
    %c0_74 = arith.constant 0 : index
    %c0_75 = arith.constant 0 : index
    %106 = vector.load %arg11[%c0_74, %c0_75] : memref<2x128xf32, #tpu.memory_space<vmem>>, vector<2x128xf32>
    tpu.vector_store %arg11[%c0_74, %c0_75], %105 {strides = array<i32>} : memref<2x128xf32, #tpu.memory_space<vmem>>, vector<2x128xf32>,
    %c0_76 = arith.constant 0 : index
    %c0_77 = arith.constant 0 : index
    %107 = vector.load %arg13[%c0_76, %c0_77] : memref<4x128xf32, #tpu.memory_space<vmem>>, vector<2x128xf32>
    tpu.vector_store %arg13[%c0_76, %c0_77], %101 {strides = array<i32>} : memref<4x128xf32, #tpu.memory_space<vmem>>, vector<2x128xf32>,
    %c2_78 = arith.constant 2 : index
    %c0_79 = arith.constant 0 : index
    %108 = vector.load %arg13[%c2_78, %c0_79] : memref<4x128xf32, #tpu.memory_space<vmem>>, vector<2x128xf32>
    tpu.vector_store %arg13[%c2_78, %c0_79], %105 {strides = array<i32>} : memref<4x128xf32, #tpu.memory_space<vmem>>, vector<2x128xf32>,
    %c0_80 = arith.constant 0 : index
    %c0_81 = arith.constant 0 : index
    %109 = vector.load %arg13[%c0_80, %c0_81] : memref<4x128xf32, #tpu.memory_space<vmem>>, vector<4x128xf32>
    %110 = arith.truncf %109 : vector<4x128xf32> to vector<4x128xbf16>
    %c0_82 = arith.constant 0 : index
    %c0_83 = arith.constant 0 : index
    %111 = vector.load %arg6[%c0_82, %c0_83] : memref<128x400xbf16, #tpu.memory_space<vmem>>, vector<128x400xbf16>
    %cst_84 = arith.constant dense<0.000000e+00> : vector<4x400xf32>
    %112 = tpu.matmul %110, %111, %cst_84 {dimension_numbers = #tpu.dot_dimension_numbers<[1], [0], [0], [1], [0, 0, 1, 1], [], []>} : vector<4x128xbf16>, vector<128x400xbf16>, vector<4x400xf32> -> vector<4x400xf32>
    %c0_85 = arith.constant 0 : index
    %c0_86 = arith.constant 0 : index
    %113 = vector.load %arg7[%c0_85, %c0_86] : memref<1x400xf32, #tpu.memory_space<vmem>>, vector<1x400xf32>
    %114 = vector.broadcast %113 : vector<1x400xf32> to vector<4x400xf32>
    %115 = arith.addf %112, %114 : vector<4x400xf32>
    %cst_87 = arith.constant 0.000000e+00 : f32
    %116 = vector.broadcast %cst_87 : f32 to vector<4x400xf32>
    %117 = arith.maximumf %115, %116 : vector<4x400xf32>
    %118 = arith.truncf %117 : vector<4x400xf32> to vector<4x400xbf16>
    %c0_88 = arith.constant 0 : index
    %c0_89 = arith.constant 0 : index
    %119 = vector.load %arg8[%c0_88, %c0_89] : memref<400x128xbf16, #tpu.memory_space<vmem>>, vector<400x128xbf16>
    %cst_90 = arith.constant dense<0.000000e+00> : vector<4x128xf32>
    %120 = tpu.matmul %118, %119, %cst_90 {dimension_numbers = #tpu.dot_dimension_numbers<[1], [0], [0], [1], [0, 0, 1, 1], [], []>} : vector<4x400xbf16>, vector<400x128xbf16>, vector<4x128xf32> -> vector<4x128xf32>
    %c0_91 = arith.constant 0 : index
    %c0_92 = arith.constant 0 : index
    %121 = vector.load %arg9[%c0_91, %c0_92] : memref<1x128xf32, #tpu.memory_space<vmem>>, vector<1x128xf32>
    %122 = vector.broadcast %121 : vector<1x128xf32> to vector<4x128xf32>
    %123 = arith.addf %120, %122 : vector<4x128xf32>
    %c0_93 = arith.constant 0 : index
    %c0_94 = arith.constant 0 : index
    %124 = vector.load %arg12[%c0_93, %c0_94] : memref<4x128xf32, #tpu.memory_space<vmem>>, vector<4x128xf32>
    tpu.vector_store %arg12[%c0_93, %c0_94], %123 {strides = array<i32>} : memref<4x128xf32, #tpu.memory_space<vmem>>, vector<4x128xf32>,
    return
  }
}

</mosaic_0001>

<bundles_post_ra>
// kernel: autoencoder_forward.1
= control target key start
LH: loop header
LB: loop body
LE: loop exit
PB: predicated region body
PF: predicated region fallthrough
CT: control target
= control target key end

     0   :  { %18 = vsyncpa [#allocation4], 0  ;;  %v2892_v1 = vmov 0.0   ;;  %vm2893_vm0 = vmmov 0   ;;  %s3661_s0 = inlined_call_operand.vmem [shape: bf16[8,2,128], index: 0, kind: input, shape index: {}]   ;;  %s3662_s1 = inlined_call_operand.vmem [shape: bf16[128,128], index: 1, kind: input, shape index: {}]   ;;  %s3663_s2 = inlined_call_operand.vmem [shape: f32[1,128], index: 2, kind: input, shape index: {}]   ;;  %s3664_s3 = inlined_call_operand.vmem [shape: bf16[8,128,128], index: 3, kind: input, shape index: {}]   ;;  %s3665_s4 = inlined_call_operand.vmem [shape: f32[1,128], index: 4, kind: input, shape index: {}]   ;;  %s3666_s5 = inlined_call_operand.vmem [shape: f32[1,128], index: 5, kind: input, shape index: {}]   ;;  %s3667_s6 = inlined_call_operand.vmem [shape: bf16[128,400], index: 6, kind: input, shape index: {}]   ;;  %s3668_s7 = inlined_call_operand.vmem [shape: f32[1,400], index: 7, kind: input, shape index: {}]   ;;  %s3669_s8 = inlined_call_operand.vmem [shape: bf16[400,128], index: 8, kind: input, shape index: {}]   ;;  %s3670_s9 = inlined_call_operand.vmem [shape: f32[1,128], index: 9, kind: input, shape index: {}]   ;;  %s3671_s10 = inlined_call_operand.hbm [shape: f32[2,128], index: 10, kind: output, shape index: {0}]   ;;  %s3672_s11 = inlined_call_operand.hbm [shape: f32[2,128], index: 11, kind: output, shape index: {1}]   ;;  %s3673_s12 = inlined_call_operand.vmem [shape: f32[4,128], index: 12, kind: output, shape index: {2}]  }
   0x1   :  { %v2965_v0 = vld [vmem:[%s3662_s1 + $0x38] sm:$0xff]   ;;  %2378 = vmatprep.subr.bf16.mxu0 %v2892_v1  ;;  %2398 = vmatprep.subr.bf16.mxu1 %v2892_v1  ;;  %v2974_v2 = vld [vmem:[%s3662_s1 + $0x30] sm:$0xff]   ;;  %v2987_v3 = vld [vmem:[%s3662_s1 + $0x28] sm:$0xff]  }
   0x2   :  { %2379 = vmatpush3.bf16.msra.mxu0 %v2965_v0  ;;  %2399 = vmatpush3.bf16.msra.mxu1 %v2965_v0  ;;  %v2996_v4 = vld [vmem:[%s3662_s1 + $0x20] sm:$0xff]   ;;  %v3005_v5 = vld [vmem:[%s3662_s1 + $0x18] sm:$0xff]   ;;  %v3014_v6 = vld [vmem:[%s3662_s1 + $0x10] sm:$0xff]  }
   0x3   :  { %2380 = vmatprep.subr.bf16.mxu0 %v2892_v1  ;;  %2400 = vmatprep.subr.bf16.mxu1 %v2892_v1  ;;  %v3021_v7 = vld [vmem:[%s3662_s1 + $0x8] sm:$0xff]   ;;  %v3030_v8 = vld [vmem:[%s3662_s1] sm:$0xff]   ;;  %v2711_v11 = vld [vmem:[%s3664_s3 + $0x78] sm:$0xff]  }
   0x4   :  { %2394 = vmatprep.mubr.msk.bf16.mxu0 %vm2893_vm0, %v2892_v1  ;;  %2414 = vmatprep.mubr.msk.bf16.mxu1 %vm2893_vm0, %v2892_v1  ;;  %v58_v9 = vld [vmem:[%s3661_s0] sm:$0x1]  ;;  %v1968_v10 = vld [vmem:[%s3661_s0 + $0x1] sm:$0x1]  ;;  %v2712_v12 = vld [vmem:[%s3664_s3 + $0x38] sm:$0xff]  }
   0x5   :  { %v2713_v13 = vld [vmem:[%s3664_s3 + $0x70] sm:$0xff]   ;;  %v2715_v15 = vld [vmem:[%s3664_s3 + $0x68] sm:$0xff]   ;;  %v2717_v17 = vld [vmem:[%s3664_s3 + $0x60] sm:$0xff]  }
   0x6   :  { %2381 = vmatpush3.bf16.msra.mxu0 %v2974_v2  ;;  %2401 = vmatpush3.bf16.msra.mxu1 %v2974_v2  ;;  %v2714_v14 = vld [vmem:[%s3664_s3 + $0x30] sm:$0xff]   ;;  %v2716_v16 = vld [vmem:[%s3664_s3 + $0x28] sm:$0xff]   ;;  %v2718_v18 = vld [vmem:[%s3664_s3 + $0x20] sm:$0xff]  }
   0x7   :  { %2382 = vmatprep.subr.bf16.mxu0 %v2892_v1  ;;  %2402 = vmatprep.subr.bf16.mxu1 %v2892_v1  ;;  %v2719_v19 = vld [vmem:[%s3664_s3 + $0x58] sm:$0xff]   ;;  %v2721_v21 = vld [vmem:[%s3664_s3 + $0x50] sm:$0xff]   ;;  %v2723_v23 = vld [vmem:[%s3664_s3 + $0x48] sm:$0xff]  }
   0x8   :  { %v2720_v20 = vld [vmem:[%s3664_s3 + $0x18] sm:$0xff]   ;;  %v2722_v22 = vld [vmem:[%s3664_s3 + $0x10] sm:$0xff]  }
   0xa   :  { %2383 = vmatpush3.bf16.msra.mxu0 %v2987_v3  ;;  %2403 = vmatpush3.bf16.msra.mxu1 %v2987_v3 }
   0xb   :  { %2384 = vmatprep.subr.bf16.mxu0 %v2892_v1  ;;  %2404 = vmatprep.subr.bf16.mxu1 %v2892_v1 }
   0xe   :  { %2385 = vmatpush3.bf16.msra.mxu0 %v2996_v4  ;;  %2405 = vmatpush3.bf16.msra.mxu1 %v2996_v4 }
   0xf   :  { %2386 = vmatprep.subr.bf16.mxu0 %v2892_v1  ;;  %2406 = vmatprep.subr.bf16.mxu1 %v2892_v1 }
  0x12   :  { %2387 = vmatpush3.bf16.msra.mxu0 %v3005_v5  ;;  %2407 = vmatpush3.bf16.msra.mxu1 %v3005_v5 }
  0x13   :  { %2388 = vmatprep.subr.bf16.mxu0 %v2892_v1  ;;  %2408 = vmatprep.subr.bf16.mxu1 %v2892_v1 }
  0x16   :  { %2389 = vmatpush3.bf16.msra.mxu0 %v3014_v6  ;;  %2409 = vmatpush3.bf16.msra.mxu1 %v3014_v6 }
  0x17   :  { %2390 = vmatprep.subr.bf16.mxu0 %v2892_v1  ;;  %2410 = vmatprep.subr.bf16.mxu1 %v2892_v1 }
  0x1a   :  { %2391 = vmatpush3.bf16.msra.mxu0 %v3021_v7  ;;  %2411 = vmatpush3.bf16.msra.mxu1 %v3021_v7 }
  0x1b   :  { %2392 = vmatprep.subr.bf16.mxu0 %v2892_v1  ;;  %2412 = vmatprep.subr.bf16.mxu1 %v2892_v1 }
  0x1e   :  { %2393 = vmatpush3.bf16.msra.mxu0 %v3030_v8  ;;  %2413 = vmatpush3.bf16.msra.mxu1 %v3030_v8 }
  0x1f   :  { %2418 = vmatprep.subr.bf16.mxu0 %v2892_v1  ;;  %2438 = vmatprep.subr.bf16.mxu1 %v2892_v1 }
  0x21   :  { %2395 = vmatmul.mubr.bf16.vlgmr.msra.gmra.mxu0 %v58_v9  ;;  %2415 = vmatmul.mubr.bf16.vlgmr.msra.gmra.mxu1 %v1968_v10 }
  0x22   :  { %2419 = vmatpush3.bf16.msra.mxu0 %v2711_v11  ;;  %2439 = vmatpush3.bf16.msra.mxu1 %v2712_v12 }
  0x23   :  { %2420 = vmatprep.subr.bf16.mxu0 %v2892_v1  ;;  %2440 = vmatprep.subr.bf16.mxu1 %v2892_v1 }
  0x24   :  { %2434 = vmatprep.mubr.msk.bf16.mxu0 %vm2893_vm0, %v2892_v1  ;;  %2454 = vmatprep.mubr.msk.bf16.mxu1 %vm2893_vm0, %v2892_v1 }
  0x26   :  { %2421 = vmatpush3.bf16.msra.mxu0 %v2713_v13  ;;  %2441 = vmatpush3.bf16.msra.mxu1 %v2714_v14 }
  0x27   :  { %2422 = vmatprep.subr.bf16.mxu0 %v2892_v1  ;;  %2442 = vmatprep.subr.bf16.mxu1 %v2892_v1 }
  0x2a   :  { %2423 = vmatpush3.bf16.msra.mxu0 %v2715_v15  ;;  %2443 = vmatpush3.bf16.msra.mxu1 %v2716_v16 }
  0x2b   :  { %2424 = vmatprep.subr.bf16.mxu0 %v2892_v1  ;;  %2444 = vmatprep.subr.bf16.mxu1 %v2892_v1 }
  0x2e   :  { %2425 = vmatpush3.bf16.msra.mxu0 %v2717_v17  ;;  %2445 = vmatpush3.bf16.msra.mxu1 %v2718_v18 }
  0x2f   :  { %2426 = vmatprep.subr.bf16.mxu0 %v2892_v1  ;;  %2446 = vmatprep.subr.bf16.mxu1 %v2892_v1 }
  0x32   :  { %2427 = vmatpush3.bf16.msra.mxu0 %v2719_v19  ;;  %2447 = vmatpush3.bf16.msra.mxu1 %v2720_v20 }
  0x33   :  { %2428 = vmatprep.subr.bf16.mxu0 %v2892_v1  ;;  %2448 = vmatprep.subr.bf16.mxu1 %v2892_v1 }
  0x36   :  { %2429 = vmatpush3.bf16.msra.mxu0 %v2721_v21  ;;  %2449 = vmatpush3.bf16.msra.mxu1 %v2722_v22 }
  0x37   :  { %2430 = vmatprep.subr.bf16.mxu0 %v2892_v1  ;;  %2450 = vmatprep.subr.bf16.mxu1 %v2892_v1 }
  0x3a   :  { %2431 = vmatpush3.bf16.msra.mxu0 %v2723_v23 }
  0x3b   :  { %2432 = vmatprep.subr.bf16.mxu0 %v2892_v1 }
  0x3c   :  { %19 = vsyncpa [#allocation6], 0  ;;  %v2724_v24 = vld [vmem:[%s3664_s3 + $0x8] sm:$0xff]   ;;  %v2725_v25 = vld [vmem:[%s3664_s3 + $0x40] sm:$0xff]   ;;  %vm1842_vm1 = vcmask 130048   ;;  %s2896_s24 = smov [#allocation5]  }
  0x3d   :  { %2451 = vmatpush3.bf16.msra.mxu1 %v2724_v24  ;;  %v2726_v26 = vld [vmem:[%s3664_s3] sm:$0xff]   ;;  %v2727_v44 = vld [vmem:[%s3664_s3 + $0xb8] sm:$0xff]   ;;  %v2728_v45 = vld [vmem:[%s3664_s3 + $0xb0] sm:$0xff]   ;;  %s1943_s1 = sshll.u32 %s2896_s24, 4  ;;  %s1944_s1 = int_to_ptr.vmem [resolvable:$true] %s1943_s1 }
  0x3e   :  { %2452 = vmatprep.subr.bf16.mxu1 %v2892_v1  ;;  %2433 = vmatpush3.bf16.msra.mxu0 %v2725_v25  ;;  %v3117_v27 = vld [vmem:[%s3663_s2] ss:$0 sm:$0xff]  ;;  %v2001_v42 = vld [vmem:[%s3661_s0 + $0x2] sm:$0x1]  ;;  %v2026_v43 = vld [vmem:[%s3661_s0 + $0x3] sm:$0x1] }
  0x3f   :  { %2458 = vmatprep.subr.bf16.mxu0 %v2892_v1  ;;  %v2729_v46 = vld [vmem:[%s3664_s3 + $0xa8] sm:$0xff]   ;;  %v2730_v47 = vld [vmem:[%s3664_s3 + $0xa0] sm:$0xff]   ;;  %v2731_v48 = vld [vmem:[%s3664_s3 + $0x98] sm:$0xff]  }
  0x40   :  { %v2732_v49 = vld [vmem:[%s3664_s3 + $0x90] sm:$0xff]   ;;  %v2051_v50 = vld [vmem:[%s3661_s0 + $0x4] sm:$0x1]  ;;  %v2733_v51 = vld [vmem:[%s3664_s3 + $0x88] sm:$0xff]  }
  0x41   :  { %2453 = vmatpush3.bf16.msra.mxu1 %v2726_v26  ;;  %v2734_v52 = vld [vmem:[%s3664_s3 + $0x80] sm:$0xff]   ;;  %v2736_v10 = vld [vmem:[%s3664_s3 + $0xf0] sm:$0xff]   ;;  %v2737_v11 = vld [vmem:[%s3664_s3 + $0xe8] sm:$0xff]  }
  0x42   :  { %2478 = vmatprep.subr.bf16.mxu1 %v2892_v1  ;;  %v2076_v53 = vld [vmem:[%s3661_s0 + $0x5] sm:$0x1]  ;;  %v2101_v54 = vld [vmem:[%s3661_s0 + $0x6] sm:$0x1]  ;;  %v2126_v55 = vld [vmem:[%s3661_s0 + $0x7] sm:$0x1] }
  0x43   :  { %v2738_v12 = vld [vmem:[%s3664_s3 + $0xe0] sm:$0xff]   ;;  %v2739_v13 = vld [vmem:[%s3664_s3 + $0xd8] sm:$0xff]   ;;  %v2740_v14 = vld [vmem:[%s3664_s3 + $0xd0] sm:$0xff]  }
  0x44   :  { %v2741_v15 = vld [vmem:[%s3664_s3 + $0xc8] sm:$0xff]   ;;  %v2742_v17 = vld [vmem:[%s3664_s3 + $0xc0] sm:$0xff]   ;;  %v2743_v22 = vld [vmem:[%s3664_s3 + $0x138] sm:$0xff]  }
  0x45   :  { %v2744_v25 = vld [vmem:[%s3664_s3 + $0x130] sm:$0xff]   ;;  %v2745_v26 = vld [vmem:[%s3664_s3 + $0x128] sm:$0xff]  }
  0xe1   :  { %v147_v28 = vpop.f32.mrf.mxu0  ;;  %v207_v29 = vpop.f32.mrf.mxu1 }
  0xe2   :  { %v148_v30 = vadd.f32 %v3117_v27, %v147_v28  ;;  %v208_v31 = vadd.f32 %v3117_v27, %v207_v29  ;;  %v2746_v28 = vld [vmem:[%s3664_s3 + $0x120] sm:$0xff]   ;;  %v2747_v29 = vld [vmem:[%s3664_s3 + $0x118] sm:$0xff]  }
  0xe3   :  { %v2416_v32 = vpop.f32.mrf.mxu1  ;;  %v2396_v33 = vpop.f32.mrf.mxu0 }
  0xe4   :  { %v153_v34 = vmax.f32 %v148_v30, 0.0  ;;  %v213_v35 = vmax.f32 %v208_v31, 0.0  ;;  %v2748_v30 = vld [vmem:[%s3664_s3 + $0x110] sm:$0xff]   ;;  %v2749_v31 = vld [vmem:[%s3664_s3 + $0x108] sm:$0xff]   ;;  %v2750_v33 = vld [vmem:[%s3664_s3 + $0x100] sm:$0xff]  }
  0xe5   :  { %v210_v36 = vpop.f32.mrf.mxu1  ;;  %v150_v37 = vpop.f32.mrf.mxu0 }
  0xe6   :  { %v154_v38 = vpack.c.bf16 %v153_v34, %v153_v34  ;;  %v214_v39 = vpack.c.bf16 %v213_v35, %v213_v35 }
  0xe7   :  { %v2417_v40 = vpop.f32.mrf.mxu1  ;;  %v2397_v41 = vpop.f32.mrf.mxu0 }
  0xe8   :  { %2435 = vmatmul.mubr.bf16.vlgmr.msra.gmra.mxu0 %v214_v39  ;;  %2455 = vmatmul.mubr.bf16.vlgmr.msra.gmra.mxu1 %v154_v38  ;;  %v2751_v38 = vld [vmem:[%s3664_s3 + $0x178] sm:$0xff]   ;;  %v2752_v41 = vld [vmem:[%s3664_s3 + $0x170] sm:$0xff]  }
  0xe9   :  { %2459 = vmatpush3.bf16.msra.mxu0 %v2965_v0  ;;  %2474 = vmatprep.mubr.msk.bf16.mxu0 %vm2893_vm0, %v2892_v1 }
  0xea   :  { %2460 = vmatprep.subr.bf16.mxu0 %v2892_v1  ;;  %2494 = vmatprep.mubr.msk.bf16.mxu1 %vm2893_vm0, %v2892_v1 }
  0xeb   :  { %2479 = vmatpush3.bf16.msra.mxu1 %v2727_v44  ;;  %v2755_v44 = vld [vmem:[%s3664_s3 + $0x158] sm:$0xff]  }
  0xec   :  { %2480 = vmatprep.subr.bf16.mxu1 %v2892_v1 }
  0xed   :  { %2461 = vmatpush3.bf16.msra.mxu0 %v2974_v2 }
  0xee   :  { %2462 = vmatprep.subr.bf16.mxu0 %v2892_v1 }
  0xef   :  { %2481 = vmatpush3.bf16.msra.mxu1 %v2728_v45  ;;  %v2756_v45 = vld [vmem:[%s3664_s3 + $0x150] sm:$0xff]  }
  0xf0   :  { %2482 = vmatprep.subr.bf16.mxu1 %v2892_v1 }
  0xf1   :  { %2463 = vmatpush3.bf16.msra.mxu0 %v2987_v3 }
  0xf2   :  { %2464 = vmatprep.subr.bf16.mxu0 %v2892_v1 }
  0xf3   :  { %2483 = vmatpush3.bf16.msra.mxu1 %v2729_v46  ;;  %v2757_v46 = vld [vmem:[%s3664_s3 + $0x148] sm:$0xff]  }
  0xf4   :  { %2484 = vmatprep.subr.bf16.mxu1 %v2892_v1 }
  0xf5   :  { %2465 = vmatpush3.bf16.msra.mxu0 %v2996_v4 }
  0xf6   :  { %2466 = vmatprep.subr.bf16.mxu0 %v2892_v1 }
  0xf7   :  { %2485 = vmatpush3.bf16.msra.mxu1 %v2730_v47 }
  0xf8   :  { %2486 = vmatprep.subr.bf16.mxu1 %v2892_v1 }
  0xf9   :  { %2467 = vmatpush3.bf16.msra.mxu0 %v3005_v5 }
  0xfa   :  { %2468 = vmatprep.subr.bf16.mxu0 %v2892_v1 }
  0xfb   :  { %2487 = vmatpush3.bf16.msra.mxu1 %v2731_v48  ;;  %v2758_v48 = vld [vmem:[%s3664_s3 + $0x140] sm:$0xff]  }
  0xfc   :  { %2488 = vmatprep.subr.bf16.mxu1 %v2892_v1 }
  0xfd   :  { %2469 = vmatpush3.bf16.msra.mxu0 %v3014_v6 }
  0xfe   :  { %2470 = vmatprep.subr.bf16.mxu0 %v2892_v1 }
  0xff   :  { %2489 = vmatpush3.bf16.msra.mxu1 %v2732_v49 }
 0x100   :  { %2490 = vmatprep.subr.bf16.mxu1 %v2892_v1 }
 0x101   :  { %2471 = vmatpush3.bf16.msra.mxu0 %v3021_v7 }
 0x102   :  { %2472 = vmatprep.subr.bf16.mxu0 %v2892_v1 }
 0x103   :  { %2491 = vmatpush3.bf16.msra.mxu1 %v2733_v51 }
 0x104   :  { %2492 = vmatprep.subr.bf16.mxu1 %v2892_v1 }
 0x105   :  { %2473 = vmatpush3.bf16.msra.mxu0 %v3030_v8 }
 0x106   :  { %2498 = vmatprep.subr.bf16.mxu0 %v2892_v1 }
 0x107   :  { %2493 = vmatpush3.bf16.msra.mxu1 %v2734_v52 }
 0x108   :  { %2475 = vmatmul.mubr.bf16.vlgmr.msra.gmra.mxu0 %v2001_v42  ;;  %2518 = vmatprep.subr.bf16.mxu1 %v2892_v1  ;;  %v2753_v42 = vld [vmem:[%s3664_s3 + $0x168] sm:$0xff]  }
 0x109   :  { %2499 = vmatpush3.bf16.msra.mxu0 %v2965_v0  ;;  %2514 = vmatprep.mubr.msk.bf16.mxu0 %vm2893_vm0, %v2892_v1 }
 0x10a   :  { %2500 = vmatprep.subr.bf16.mxu0 %v2892_v1 }
 0x10d   :  { %2501 = vmatpush3.bf16.msra.mxu0 %v2974_v2 }
 0x10e   :  { %2502 = vmatprep.subr.bf16.mxu0 %v2892_v1 }
 0x111   :  { %2503 = vmatpush3.bf16.msra.mxu0 %v2987_v3 }
 0x112   :  { %2504 = vmatprep.subr.bf16.mxu0 %v2892_v1 }
 0x115   :  { %2505 = vmatpush3.bf16.msra.mxu0 %v2996_v4 }
 0x116   :  { %2506 = vmatprep.subr.bf16.mxu0 %v2892_v1 }
 0x119   :  { %2507 = vmatpush3.bf16.msra.mxu0 %v3005_v5 }
 0x11a   :  { %2508 = vmatprep.subr.bf16.mxu0 %v2892_v1 }
 0x11d   :  { %2509 = vmatpush3.bf16.msra.mxu0 %v3014_v6 }
 0x11e   :  { %2510 = vmatprep.subr.bf16.mxu0 %v2892_v1 }
 0x121   :  { %2511 = vmatpush3.bf16.msra.mxu0 %v3021_v7 }
 0x122   :  { %2512 = vmatprep.subr.bf16.mxu0 %v2892_v1 }
 0x125   :  { %2513 = vmatpush3.bf16.msra.mxu0 %v3030_v8 }
 0x126   :  { %2538 = vmatprep.subr.bf16.mxu0 %v2892_v1 }
 0x128   :  { %2515 = vmatmul.mubr.bf16.vlgmr.msra.gmra.mxu0 %v2026_v43  ;;  %v2754_v43 = vld [vmem:[%s3664_s3 + $0x160] sm:$0xff]  }
 0x129   :  { %2539 = vmatpush3.bf16.msra.mxu0 %v2965_v0  ;;  %2554 = vmatprep.mubr.msk.bf16.mxu0 %vm2893_vm0, %v2892_v1 }
 0x12a   :  { %2540 = vmatprep.subr.bf16.mxu0 %v2892_v1 }
 0x12d   :  { %2541 = vmatpush3.bf16.msra.mxu0 %v2974_v2 }
 0x12e   :  { %2542 = vmatprep.subr.bf16.mxu0 %v2892_v1 }
 0x131   :  { %2543 = vmatpush3.bf16.msra.mxu0 %v2987_v3 }
 0x132   :  { %2544 = vmatprep.subr.bf16.mxu0 %v2892_v1 }
 0x135   :  { %2545 = vmatpush3.bf16.msra.mxu0 %v2996_v4 }
 0x136   :  { %2546 = vmatprep.subr.bf16.mxu0 %v2892_v1 }
 0x139   :  { %2547 = vmatpush3.bf16.msra.mxu0 %v3005_v5 }
 0x13a   :  { %2548 = vmatprep.subr.bf16.mxu0 %v2892_v1 }
 0x13d   :  { %2549 = vmatpush3.bf16.msra.mxu0 %v3014_v6 }
 0x13e   :  { %2550 = vmatprep.subr.bf16.mxu0 %v2892_v1 }
 0x141   :  { %2551 = vmatpush3.bf16.msra.mxu0 %v3021_v7 }
 0x142   :  { %2552 = vmatprep.subr.bf16.mxu0 %v2892_v1 }
 0x145   :  { %2553 = vmatpush3.bf16.msra.mxu0 %v3030_v8 }
 0x146   :  { %2578 = vmatprep.subr.bf16.mxu0 %v2892_v1 }
 0x148   :  { %2555 = vmatmul.mubr.bf16.vlgmr.msra.gmra.mxu0 %v2051_v50 }
 0x149   :  { %2579 = vmatpush3.bf16.msra.mxu0 %v2965_v0  ;;  %2594 = vmatprep.mubr.msk.bf16.mxu0 %vm2893_vm0, %v2892_v1 }
 0x14a   :  { %2580 = vmatprep.subr.bf16.mxu0 %v2892_v1 }
 0x14d   :  { %2581 = vmatpush3.bf16.msra.mxu0 %v2974_v2 }
 0x14e   :  { %2582 = vmatprep.subr.bf16.mxu0 %v2892_v1 }
 0x151   :  { %2583 = vmatpush3.bf16.msra.mxu0 %v2987_v3 }
 0x152   :  { %2584 = vmatprep.subr.bf16.mxu0 %v2892_v1 }
 0x155   :  { %2585 = vmatpush3.bf16.msra.mxu0 %v2996_v4 }
 0x156   :  { %2586 = vmatprep.subr.bf16.mxu0 %v2892_v1 }
 0x159   :  { %2587 = vmatpush3.bf16.msra.mxu0 %v3005_v5 }
 0x15a   :  { %2588 = vmatprep.subr.bf16.mxu0 %v2892_v1 }
 0x15d   :  { %2589 = vmatpush3.bf16.msra.mxu0 %v3014_v6 }
 0x15e   :  { %2590 = vmatprep.subr.bf16.mxu0 %v2892_v1 }
 0x161   :  { %2591 = vmatpush3.bf16.msra.mxu0 %v3021_v7 }
 0x162   :  { %2592 = vmatprep.subr.bf16.mxu0 %v2892_v1 }
 0x165   :  { %2593 = vmatpush3.bf16.msra.mxu0 %v3030_v8 }
 0x166   :  { %2618 = vmatprep.subr.bf16.mxu0 %v2892_v1 }
 0x168   :  { %2595 = vmatmul.mubr.bf16.vlgmr.msra.gmra.mxu0 %v2076_v53  ;;  %v2759_v53 = vld [vmem:[%s3664_s3 + $0x1b8] sm:$0xff]  }
 0x169   :  { %2619 = vmatpush3.bf16.msra.mxu0 %v2965_v0  ;;  %2634 = vmatprep.mubr.msk.bf16.mxu0 %vm2893_vm0, %v2892_v1 }
 0x16a   :  { %2620 = vmatprep.subr.bf16.mxu0 %v2892_v1 }
 0x16d   :  { %2621 = vmatpush3.bf16.msra.mxu0 %v2974_v2 }
 0x16e   :  { %2622 = vmatprep.subr.bf16.mxu0 %v2892_v1 }
 0x171   :  { %2623 = vmatpush3.bf16.msra.mxu0 %v2987_v3 }
 0x172   :  { %2624 = vmatprep.subr.bf16.mxu0 %v2892_v1 }
 0x175   :  { %2625 = vmatpush3.bf16.msra.mxu0 %v2996_v4 }
 0x176   :  { %2626 = vmatprep.subr.bf16.mxu0 %v2892_v1 }
 0x179   :  { %2627 = vmatpush3.bf16.msra.mxu0 %v3005_v5 }
 0x17a   :  { %2628 = vmatprep.subr.bf16.mxu0 %v2892_v1 }
 0x17d   :  { %2629 = vmatpush3.bf16.msra.mxu0 %v3014_v6 }
 0x17e   :  { %2630 = vmatprep.subr.bf16.mxu0 %v2892_v1 }
 0x181   :  { %2631 = vmatpush3.bf16.msra.mxu0 %v3021_v7 }
 0x182   :  { %2632 = vmatprep.subr.bf16.mxu0 %v2892_v1 }
 0x185   :  { %2633 = vmatpush3.bf16.msra.mxu0 %v3030_v8 }
 0x186   :  { %2658 = vmatprep.subr.bf16.mxu0 %v2892_v1 }
 0x188   :  { %2635 = vmatmul.mubr.bf16.vlgmr.msra.gmra.mxu0 %v2101_v54 }
 0x189   :  { %2659 = vmatpush3.bf16.msra.mxu0 %v2965_v0  ;;  %2674 = vmatprep.mubr.msk.bf16.mxu0 %vm2893_vm0, %v2892_v1 }
 0x18a   :  { %2660 = vmatprep.subr.bf16.mxu0 %v2892_v1 }
 0x18d   :  { %2661 = vmatpush3.bf16.msra.mxu0 %v2974_v2 }
 0x18e   :  { %2662 = vmatprep.subr.bf16.mxu0 %v2892_v1 }
 0x191   :  { %2663 = vmatpush3.bf16.msra.mxu0 %v2987_v3 }
 0x192   :  { %2664 = vmatprep.subr.bf16.mxu0 %v2892_v1 }
 0x195   :  { %2665 = vmatpush3.bf16.msra.mxu0 %v2996_v4 }
 0x196   :  { %2666 = vmatprep.subr.bf16.mxu0 %v2892_v1 }
 0x199   :  { %2667 = vmatpush3.bf16.msra.mxu0 %v3005_v5 }
 0x19a   :  { %2668 = vmatprep.subr.bf16.mxu0 %v2892_v1 }
 0x19d   :  { %2669 = vmatpush3.bf16.msra.mxu0 %v3014_v6 }
 0x19e   :  { %2670 = vmatprep.subr.bf16.mxu0 %v2892_v1 }
 0x1a1   :  { %2671 = vmatpush3.bf16.msra.mxu0 %v3021_v7  ;;  %v2735_v7 = vld [vmem:[%s3664_s3 + $0xf8] sm:$0xff]  }
 0x1a2   :  { %2672 = vmatprep.subr.bf16.mxu0 %v2892_v1 }
 0x1a5   :  { %2673 = vmatpush3.bf16.msra.mxu0 %v3030_v8 }
 0x1a8   :  { %2675 = vmatmul.mubr.bf16.vlgmr.msra.gmra.mxu0 %v2126_v55  ;;  %v314_v56 = vpop.f32.mrf.mxu0  ;;  %v402_v57 = vpop.f32.mrf.mxu1 }
 0x1a9   :  { %v3280_v58 = vadd.f32 %v402_v57, %v314_v56  ;;  %v2760_v56 = vld [vmem:[%s3664_s3 + $0x1b0] sm:$0xff]   ;;  %v2761_v57 = vld [vmem:[%s3664_s3 + $0x1a8] sm:$0xff]  }
 0x1aa   :  { %v2436_v59 = vpop.f32.mrf.mxu0  ;;  %v2456_v60 = vpop.f32.mrf.mxu1 }
 0x1ab   :  { %v2762_v59 = vld [vmem:[%s3664_s3 + $0x1a0] sm:$0xff]   ;;  %v2763_v60 = vld [vmem:[%s3664_s3 + $0x198] sm:$0xff]  }
 0x1ac   :  { %v317_v61 = vpop.f32.mrf.mxu0  ;;  %v405_v62 = vpop.f32.mrf.mxu1 }
 0x1ad   :  { %v2764_v61 = vld [vmem:[%s3664_s3 + $0x190] sm:$0xff]   ;;  %v2765_v62 = vld [vmem:[%s3664_s3 + $0x188] sm:$0xff]  }
 0x1ae   :  { %v2437_v63 = vpop.f32.mrf.mxu0  ;;  %v2457_v0 = vpop.f32.mrf.mxu1 }
 0x1af   :  { %v2766_v0 = vld [vmem:[%s3664_s3 + $0x180] sm:$0xff]  }
 0x1c8   :  { %v444_v2 = vpop.f32.mrf.mxu0 }
 0x1c9   :  { %v445_v3 = vadd.f32 %v3117_v27, %v444_v2 }
 0x1ca   :  { %v2476_v4 = vpop.f32.mrf.mxu0 }
 0x1cb   :  { %v450_v5 = vmax.f32 %v445_v3, 0.0 }
 0x1cc   :  { %v447_v6 = vpop.f32.mrf.mxu0 }
 0x1cd   :  { %v451_v8 = vpack.c.bf16 %v450_v5, %v450_v5  ;;  %v2767_v6 = vld [vmem:[%s3664_s3 + $0x1f8] sm:$0xff]  }
 0x1ce   :  { %v2477_v9 = vpop.f32.mrf.mxu0 }
 0x1cf   :  { %2495 = vmatmul.mubr.bf16.vlgmr.msra.gmra.mxu1 %v451_v8  ;;  %v2768_v9 = vld [vmem:[%s3664_s3 + $0x1f0] sm:$0xff]  }
 0x1d0   :  { %2519 = vmatpush3.bf16.msra.mxu1 %v2735_v7  ;;  %2534 = vmatprep.mubr.msk.bf16.mxu1 %vm2893_vm0, %v2892_v1 }
 0x1d1   :  { %2520 = vmatprep.subr.bf16.mxu1 %v2892_v1 }
 0x1d4   :  { %2521 = vmatpush3.bf16.msra.mxu1 %v2736_v10  ;;  %v2769_v10 = vld [vmem:[%s3664_s3 + $0x1e8] sm:$0xff]  }
 0x1d5   :  { %2522 = vmatprep.subr.bf16.mxu1 %v2892_v1 }
 0x1d8   :  { %2523 = vmatpush3.bf16.msra.mxu1 %v2737_v11  ;;  %v2770_v11 = vld [vmem:[%s3664_s3 + $0x1e0] sm:$0xff]  }
 0x1d9   :  { %2524 = vmatprep.subr.bf16.mxu1 %v2892_v1 }
 0x1dc   :  { %2525 = vmatpush3.bf16.msra.mxu1 %v2738_v12  ;;  %v2771_v12 = vld [vmem:[%s3664_s3 + $0x1d8] sm:$0xff]  }
 0x1dd   :  { %2526 = vmatprep.subr.bf16.mxu1 %v2892_v1 }
 0x1e0   :  { %2527 = vmatpush3.bf16.msra.mxu1 %v2739_v13  ;;  %v2772_v13 = vld [vmem:[%s3664_s3 + $0x1d0] sm:$0xff]  }
 0x1e1   :  { %2528 = vmatprep.subr.bf16.mxu1 %v2892_v1 }
 0x1e4   :  { %2529 = vmatpush3.bf16.msra.mxu1 %v2740_v14  ;;  %v2773_v14 = vld [vmem:[%s3664_s3 + $0x1c8] sm:$0xff]  }
 0x1e5   :  { %2530 = vmatprep.subr.bf16.mxu1 %v2892_v1 }
 0x1e8   :  { %v594_v16 = vpop.f32.mrf.mxu0  ;;  %2531 = vmatpush3.bf16.msra.mxu1 %v2741_v15 }
 0x1e9   :  { %v595_v18 = vadd.f32 %v3117_v27, %v594_v16  ;;  %2532 = vmatprep.subr.bf16.mxu1 %v2892_v1  ;;  %v2774_v16 = vld [vmem:[%s3664_s3 + $0x1c0] sm:$0xff]  }
 0x1ea   :  { %v2516_v19 = vpop.f32.mrf.mxu0 }
 0x1eb   :  { %v600_v20 = vmax.f32 %v595_v18, 0.0 }
 0x1ec   :  { %v597_v21 = vpop.f32.mrf.mxu0  ;;  %2533 = vmatpush3.bf16.msra.mxu1 %v2742_v17 }
 0x1ed   :  { %v601_v23 = vpack.c.bf16 %v600_v20, %v600_v20  ;;  %2558 = vmatprep.subr.bf16.mxu1 %v2892_v1 }
 0x1ee   :  { %v2517_v24 = vpop.f32.mrf.mxu0 }
 0x1ef   :  { %2535 = vmatmul.mubr.bf16.vlgmr.msra.gmra.mxu1 %v601_v23 }
 0x1f0   :  { %2559 = vmatpush3.bf16.msra.mxu1 %v2743_v22  ;;  %2574 = vmatprep.mubr.msk.bf16.mxu1 %vm2893_vm0, %v2892_v1 }
 0x1f1   :  { %2560 = vmatprep.subr.bf16.mxu1 %v2892_v1 }
 0x1f4   :  { %2561 = vmatpush3.bf16.msra.mxu1 %v2744_v25 }
 0x1f5   :  { %2562 = vmatprep.subr.bf16.mxu1 %v2892_v1 }
 0x1f8   :  { %2563 = vmatpush3.bf16.msra.mxu1 %v2745_v26 }
 0x1f9   :  { %2564 = vmatprep.subr.bf16.mxu1 %v2892_v1 }
 0x1fc   :  { %2565 = vmatpush3.bf16.msra.mxu1 %v2746_v28 }
 0x1fd   :  { %2566 = vmatprep.subr.bf16.mxu1 %v2892_v1 }
 0x200   :  { %2567 = vmatpush3.bf16.msra.mxu1 %v2747_v29  ;;  %v2775_v29 = vld [vmem:[%s3667_s6 + $0xe0] ss:$16 sps:$4 sm:$0xff]  }
 0x201   :  { %2568 = vmatprep.subr.bf16.mxu1 %v2892_v1 }
 0x204   :  { %2569 = vmatpush3.bf16.msra.mxu1 %v2748_v30  ;;  %v2780_v30 = vld [vmem:[%s3667_s6 + $0xec] ss:$16 sps:$4 sm:$0xff]  }
 0x205   :  { %2570 = vmatprep.subr.bf16.mxu1 %v2892_v1 }
 0x208   :  { %v744_v32 = vpop.f32.mrf.mxu0  ;;  %2571 = vmatpush3.bf16.msra.mxu1 %v2749_v31  ;;  %v2786_v31 = vld [vmem:[%s3667_s6 + $0xcc] ss:$16 sps:$4 sm:$0xff]  }
 0x209   :  { %v745_v34 = vadd.f32 %v3117_v27, %v744_v32  ;;  %2572 = vmatprep.subr.bf16.mxu1 %v2892_v1  ;;  %v2781_v32 = vld [vmem:[%s3667_s6 + $0xc0] ss:$16 sps:$4 sm:$0xff]  }
 0x20a   :  { %v2556_v35 = vpop.f32.mrf.mxu0 }
 0x20b   :  { %v750_v36 = vmax.f32 %v745_v34, 0.0  ;;  %v2789_v34 = vld [vmem:[%s3667_s6 + $0xa4] ss:$16 sps:$4 sm:$0xff]   ;;  %v2792_v35 = vld [vmem:[%s3667_s6 + $0xac] ss:$16 sps:$4 sm:$0xff]  }
 0x20c   :  { %v747_v37 = vpop.f32.mrf.mxu0  ;;  %2573 = vmatpush3.bf16.msra.mxu1 %v2750_v33  ;;  %v2784_v33 = vld [vmem:[%s3667_s6 + $0xc8] ss:$16 sps:$4 sm:$0xff]  }
 0x20d   :  { %v751_v39 = vpack.c.bf16 %v750_v36, %v750_v36  ;;  %2598 = vmatprep.subr.bf16.mxu1 %v2892_v1  ;;  %v2787_v36 = vld [vmem:[%s3667_s6 + $0xa0] ss:$16 sps:$4 sm:$0xff]   ;;  %v2790_v37 = vld [vmem:[%s3667_s6 + $0xa8] ss:$16 sps:$4 sm:$0xff]  }
 0x20e   :  { %v2557_v40 = vpop.f32.mrf.mxu0 }
 0x20f   :  { %2575 = vmatmul.mubr.bf16.vlgmr.msra.gmra.mxu1 %v751_v39  ;;  %v2798_v39 = vld [vmem:[%s3667_s6 + $0x8c] ss:$16 sps:$4 sm:$0xff]   ;;  %v2793_v40 = vld [vmem:[%s3667_s6 + $0x80] ss:$16 sps:$4 sm:$0xff]  }
 0x210   :  { %2599 = vmatpush3.bf16.msra.mxu1 %v2751_v38  ;;  %2614 = vmatprep.mubr.msk.bf16.mxu1 %vm2893_vm0, %v2892_v1  ;;  %v2795_v38 = vld [vmem:[%s3667_s6 + $0x84] ss:$16 sps:$4 sm:$0xff]  }
 0x211   :  { %2600 = vmatprep.subr.bf16.mxu1 %v2892_v1 }
 0x214   :  { %2601 = vmatpush3.bf16.msra.mxu1 %v2752_v41  ;;  %v2796_v41 = vld [vmem:[%s3667_s6 + $0x88] ss:$16 sps:$4 sm:$0xff]  }
 0x215   :  { %2602 = vmatprep.subr.bf16.mxu1 %v2892_v1 }
 0x218   :  { %2603 = vmatpush3.bf16.msra.mxu1 %v2753_v42 }
 0x219   :  { %2604 = vmatprep.subr.bf16.mxu1 %v2892_v1 }
 0x21c   :  { %2605 = vmatpush3.bf16.msra.mxu1 %v2754_v43 }
 0x21d   :  { %2606 = vmatprep.subr.bf16.mxu1 %v2892_v1 }
 0x220   :  { %2607 = vmatpush3.bf16.msra.mxu1 %v2755_v44  ;;  %v2801_v44 = vld [vmem:[%s3667_s6 + $0x64] ss:$16 sps:$4 sm:$0xff]  }
 0x221   :  { %2608 = vmatprep.subr.bf16.mxu1 %v2892_v1 }
 0x224   :  { %2609 = vmatpush3.bf16.msra.mxu1 %v2756_v45  ;;  %v2804_v45 = vld [vmem:[%s3667_s6 + $0x6c] ss:$16 sps:$4 sm:$0xff]  }
 0x225   :  { %2610 = vmatprep.subr.bf16.mxu1 %v2892_v1 }
 0x228   :  { %v894_v47 = vpop.f32.mrf.mxu0  ;;  %2611 = vmatpush3.bf16.msra.mxu1 %v2757_v46 }
 0x229   :  { %v895_v49 = vadd.f32 %v3117_v27, %v894_v47  ;;  %2612 = vmatprep.subr.bf16.mxu1 %v2892_v1  ;;  %v2799_v47 = vld [vmem:[%s3667_s6 + $0x60] ss:$16 sps:$4 sm:$0xff]  }
 0x22a   :  { %v2596_v50 = vpop.f32.mrf.mxu0 }
 0x22b   :  { %v900_v51 = vmax.f32 %v895_v49, 0.0  ;;  %v2807_v50 = vld [vmem:[%s3667_s6 + $0x44] ss:$16 sps:$4 sm:$0xff]  }
 0x22c   :  { %v897_v52 = vpop.f32.mrf.mxu0  ;;  %2613 = vmatpush3.bf16.msra.mxu1 %v2758_v48  ;;  %v2802_v48 = vld [vmem:[%s3667_s6 + $0x68] ss:$16 sps:$4 sm:$0xff]  }
 0x22d   :  { %v901_v54 = vpack.c.bf16 %v900_v51, %v900_v51  ;;  %2638 = vmatprep.subr.bf16.mxu1 %v2892_v1  ;;  %v2810_v51 = vld [vmem:[%s3667_s6 + $0x4c] ss:$16 sps:$4 sm:$0xff]  }
 0x22e   :  { %v2597_v55 = vpop.f32.mrf.mxu0 }
 0x22f   :  { %2615 = vmatmul.mubr.bf16.vlgmr.msra.gmra.mxu1 %v901_v54  ;;  %v2808_v54 = vld [vmem:[%s3667_s6 + $0x48] ss:$16 sps:$4 sm:$0xff]   ;;  %v2811_v55 = vld [vmem:[%s3667_s6 + $0x20] ss:$16 sps:$4 sm:$0xff]  }
 0x230   :  { %2639 = vmatpush3.bf16.msra.mxu1 %v2759_v53  ;;  %2654 = vmatprep.mubr.msk.bf16.mxu1 %vm2893_vm0, %v2892_v1  ;;  %v2805_v53 = vld [vmem:[%s3667_s6 + $0x40] ss:$16 sps:$4 sm:$0xff]  }
 0x231   :  { %2640 = vmatprep.subr.bf16.mxu1 %v2892_v1 }
 0x234   :  { %2641 = vmatpush3.bf16.msra.mxu1 %v2760_v56  ;;  %v2813_v56 = vld [vmem:[%s3667_s6 + $0x24] ss:$16 sps:$4 sm:$0xff]  }
 0x235   :  { %2642 = vmatprep.subr.bf16.mxu1 %v2892_v1 }
 0x238   :  { %2643 = vmatpush3.bf16.msra.mxu1 %v2761_v57  ;;  %v2814_v57 = vld [vmem:[%s3667_s6 + $0x28] ss:$16 sps:$4 sm:$0xff]  }
 0x239   :  { %2644 = vmatprep.subr.bf16.mxu1 %v2892_v1 }
 0x23c   :  { %2645 = vmatpush3.bf16.msra.mxu1 %v2762_v59  ;;  %v2816_v59 = vld [vmem:[%s3667_s6 + $0x2c] ss:$16 sps:$4 sm:$0xff]  }
 0x23d   :  { %2646 = vmatprep.subr.bf16.mxu1 %v2892_v1 }
 0x240   :  { %2647 = vmatpush3.bf16.msra.mxu1 %v2763_v60  ;;  %v2819_v60 = vld [vmem:[%s3667_s6 + $0x4] ss:$16 sps:$4 sm:$0xff]  }
 0x241   :  { %2648 = vmatprep.subr.bf16.mxu1 %v2892_v1 }
 0x244   :  { %2649 = vmatpush3.bf16.msra.mxu1 %v2764_v61  ;;  %v2822_v61 = vld [vmem:[%s3667_s6 + $0xc] ss:$16 sps:$4 sm:$0xff]  }
 0x245   :  { %2650 = vmatprep.subr.bf16.mxu1 %v2892_v1 }
 0x248   :  { %v1044_v63 = vpop.f32.mrf.mxu0  ;;  %2651 = vmatpush3.bf16.msra.mxu1 %v2765_v62  ;;  %v2817_v62 = vld [vmem:[%s3667_s6] ss:$16 sps:$4 sm:$0xff]  }
 0x249   :  { %v1045_v2 = vadd.f32 %v3117_v27, %v1044_v63  ;;  %2652 = vmatprep.subr.bf16.mxu1 %v2892_v1  ;;  %v2820_v63 = vld [vmem:[%s3667_s6 + $0x8] ss:$16 sps:$4 sm:$0xff]  }
 0x24a   :  { %v2636_v3 = vpop.f32.mrf.mxu0 }
 0x24b   :  { %v1050_v4 = vmax.f32 %v1045_v2, 0.0  ;;  %v2824_v2 = vld [vmem:[%s3669_s8 + $0x78] sm:$0xff]  }
 0x24c   :  { %v1047_v5 = vpop.f32.mrf.mxu0  ;;  %2653 = vmatpush3.bf16.msra.mxu1 %v2766_v0  ;;  %v2894_v0 = vmov 0  }
 0x24d   :  { %v1051_v7 = vpack.c.bf16 %v1050_v4, %v1050_v4  ;;  %2678 = vmatprep.subr.bf16.mxu1 %v2892_v1  ;;  %1577 = vmatprep.mubr.bf16.mxu0 %v2894_v0 }
 0x24e   :  { %v2637_v8 = vpop.f32.mrf.mxu0 }
 0x24f   :  { %2655 = vmatmul.mubr.bf16.vlgmr.msra.gmra.mxu1 %v1051_v7 }
 0x250   :  { %2679 = vmatpush3.bf16.msra.mxu1 %v2767_v6  ;;  %2694 = vmatprep.mubr.msk.bf16.mxu1 %vm2893_vm0, %v2892_v1 }
 0x251   :  { %2680 = vmatprep.subr.bf16.mxu1 %v2892_v1 }
 0x254   :  { %2681 = vmatpush3.bf16.msra.mxu1 %v2768_v9 }
 0x255   :  { %2682 = vmatprep.subr.bf16.mxu1 %v2892_v1 }
 0x258   :  { %2683 = vmatpush3.bf16.msra.mxu1 %v2769_v10 }
 0x259   :  { %2684 = vmatprep.subr.bf16.mxu1 %v2892_v1 }
 0x25c   :  { %2685 = vmatpush3.bf16.msra.mxu1 %v2770_v11 }
 0x25d   :  { %2686 = vmatprep.subr.bf16.mxu1 %v2892_v1 }
 0x260   :  { %2687 = vmatpush3.bf16.msra.mxu1 %v2771_v12 }
 0x261   :  { %2688 = vmatprep.subr.bf16.mxu1 %v2892_v1 }
 0x264   :  { %2689 = vmatpush3.bf16.msra.mxu1 %v2772_v13 }
 0x265   :  { %2690 = vmatprep.subr.bf16.mxu1 %v2892_v1 }
 0x268   :  { %v1194_v15 = vpop.f32.mrf.mxu0  ;;  %2691 = vmatpush3.bf16.msra.mxu1 %v2773_v14 }
 0x269   :  { %v1195_v17 = vadd.f32 %v3117_v27, %v1194_v15  ;;  %2692 = vmatprep.subr.bf16.mxu1 %v2892_v1  ;;  %v2777_v1 = vld [vmem:[%s3667_s6 + $0xe4] ss:$16 sps:$4 sm:$0xff]   ;;  %v2778_v27 = vld [vmem:[%s3667_s6 + $0xe8] ss:$16 sps:$4 sm:$0xff]  }
 0x26a   :  { %v2676_v18 = vpop.f32.mrf.mxu0  ;;  %1545 = vmatprep.subr.bf16.mxu0 %v2777_v1  ;;  %v2823_v1 = vld [vmem:[%s3669_s8 + $0xb8] sm:$0xff]  }
 0x26b   :  { %v1200_v19 = vmax.f32 %v1195_v17, 0.0  ;;  %1546 = vmatpush1.bf16.msra.mxu0 %v2775_v29 }
 0x26c   :  { %v1197_v20 = vpop.f32.mrf.mxu0  ;;  %2693 = vmatpush3.bf16.msra.mxu1 %v2774_v16 }
 0x26d   :  { %v1201_v21 = vpack.c.bf16 %v1200_v19, %v1200_v19  ;;  %1586 = vmatprep.subr.bf16.mxu1 %v2780_v30  ;;  %v2151_v19 = vld [vmem:[%s3665_s4] ss:$0 sm:$0xff] }
 0x26e   :  { %v2677_v22 = vpop.f32.mrf.mxu0 }
 0x26f   :  { %2695 = vmatmul.mubr.bf16.vlgmr.msra.gmra.mxu1 %v1201_v21 }
 0x270   :  { %1587 = vmatpush1.bf16.msra.mxu1 %v2778_v27  ;;  %1618 = vmatprep.mubr.bf16.mxu1 %v2894_v0  ;;  %v2825_v27 = vld [vmem:[%s3669_s8 + $0x38] sm:$0xff]  }
 0x271   :  { %1588 = vmatprep.subr.bf16.mxu1 %v2786_v31  ;;  %v2826_v31 = vld [vmem:[%s3669_s8 + $0xb0] sm:$0xff]  }
 0x274   :  { %1589 = vmatpush1.bf16.msra.mxu1 %v2784_v33  ;;  %v2830_v33 = vld [vmem:[%s3669_s8 + $0x68] sm:$0xff]  }
 0x275   :  { %1590 = vmatprep.subr.bf16.mxu1 %v2792_v35  ;;  %v2831_v35 = vld [vmem:[%s3669_s8 + $0x28] sm:$0xff]  }
 0x278   :  { %1591 = vmatpush1.bf16.msra.mxu1 %v2790_v37  ;;  %v2832_v37 = vld [vmem:[%s3669_s8 + $0xa0] sm:$0xff]  }
 0x279   :  { %1592 = vmatprep.subr.bf16.mxu1 %v2798_v39  ;;  %v2836_v39 = vld [vmem:[%s3669_s8 + $0x58] sm:$0xff]  }
 0x27c   :  { %1593 = vmatpush1.bf16.msra.mxu1 %v2796_v41  ;;  %v2837_v41 = vld [vmem:[%s3669_s8 + $0x18] sm:$0xff]  }
 0x27d   :  { %1594 = vmatprep.subr.bf16.mxu1 %v2804_v45  ;;  %v2841_v45 = vld [vmem:[%s3669_s8 + $0x88] sm:$0xff]  }
 0x280   :  { %1595 = vmatpush1.bf16.msra.mxu1 %v2802_v48  ;;  %v2844_v48 = vld [vmem:[%s3669_s8 + $0x80] sm:$0xff]  }
 0x281   :  { %1596 = vmatprep.subr.bf16.mxu1 %v2810_v51  ;;  %v2847_v51 = vld [vmem:[%s3669_s8 + $0xc0] sm:$0xff]  }
 0x284   :  { %1597 = vmatpush1.bf16.msra.mxu1 %v2808_v54 }
 0x285   :  { %1598 = vmatprep.subr.bf16.mxu1 %v2816_v59 }
 0x288   :  { %1599 = vmatpush1.bf16.msra.mxu1 %v2814_v57 }
 0x289   :  { %1600 = vmatprep.subr.bf16.mxu1 %v2822_v61 }
 0x28c   :  { %1601 = vmatpush1.bf16.msra.mxu1 %v2820_v63 }
 0x28d   :  { %1886 = vmatprep.subr.bf16.mxu1 %v2894_v0 }
 0x28f   :  { %v551_v23 = vpop.f32.mrf.mxu1 }
 0x290   :  { %v557_v24 = vadd.f32 %v551_v23, %v3280_v58  ;;  %v2783_v58 = vld [vmem:[%s3667_s6 + $0xc4] ss:$16 sps:$4 sm:$0xff]   ;;  %v2152_v23 = vld [vmem:[%s3666_s5] ss:$0 sm:$0xff] }
 0x291   :  { %v2496_v25 = vpop.f32.mrf.mxu1  ;;  %1547 = vmatprep.subr.bf16.mxu0 %v2783_v58  ;;  %v2827_v58 = vld [vmem:[%s3669_s8 + $0x70] sm:$0xff]  }
 0x292   :  { %1548 = vmatpush1.bf16.msra.mxu0 %v2781_v32  ;;  %v2828_v32 = vld [vmem:[%s3669_s8 + $0x30] sm:$0xff]  }
 0x293   :  { %v554_v26 = vpop.f32.mrf.mxu1  ;;  %1549 = vmatprep.subr.bf16.mxu0 %v2789_v34  ;;  %v2829_v34 = vld [vmem:[%s3669_s8 + $0xa8] sm:$0xff]  }
 0x295   :  { %v2497_v28 = vpop.f32.mrf.mxu1 }
 0x296   :  { %1550 = vmatpush1.bf16.msra.mxu0 %v2787_v36  ;;  %v2833_v36 = vld [vmem:[%s3669_s8 + $0x60] sm:$0xff]  }
 0x297   :  { %1551 = vmatprep.subr.bf16.mxu0 %v2795_v38  ;;  %v2834_v38 = vld [vmem:[%s3669_s8 + $0x20] sm:$0xff]  }
 0x29a   :  { %1552 = vmatpush1.bf16.msra.mxu0 %v2793_v40  ;;  %v2835_v40 = vld [vmem:[%s3669_s8 + $0x98] sm:$0xff]  }
 0x29b   :  { %1553 = vmatprep.subr.bf16.mxu0 %v2801_v44  ;;  %v2840_v44 = vld [vmem:[%s3669_s8 + $0x10] sm:$0xff]  }
 0x29e   :  { %1554 = vmatpush1.bf16.msra.mxu0 %v2799_v47  ;;  %v2843_v47 = vld [vmem:[%s3669_s8 + $0x8] sm:$0xff]  }
 0x29f   :  { %1555 = vmatprep.subr.bf16.mxu0 %v2807_v50  ;;  %v2846_v50 = vld [vmem:[%s3669_s8] sm:$0xff]  }
 0x2a2   :  { %1556 = vmatpush1.bf16.msra.mxu0 %v2805_v53 }
 0x2a3   :  { %1557 = vmatprep.subr.bf16.mxu0 %v2813_v56  ;;  %v1363_v56 = vld [vmem:[%s3668_s7] sm:$0xf]  ;;  %s2895_s7 = smov [#allocation3]  }
 0x2a6   :  { %1558 = vmatpush1.bf16.msra.mxu0 %v2811_v55 }
 0x2a7   :  { %1559 = vmatprep.subr.bf16.mxu0 %v2819_v60 }
 0x2aa   :  { %1560 = vmatpush1.bf16.msra.mxu0 %v2817_v62 }
 0x2ab   :  { %2356 = vmatprep.subr.bf16.mxu0 %v2824_v2 }
 0x2af   :  { %v701_v42 = vpop.f32.mrf.mxu1 }
 0x2b0   :  { %v707_v43 = vadd.f32 %v701_v42, %v557_v24  ;;  %v2839_v42 = vld [vmem:[%s3669_s8 + $0x50] sm:$0xff]  }
 0x2b1   :  { %v2536_v46 = vpop.f32.mrf.mxu1 }
 0x2b2   :  { %v2842_v46 = vld [vmem:[%s3669_s8 + $0x48] sm:$0xff]  }
 0x2b3   :  { %v704_v49 = vpop.f32.mrf.mxu1 }
 0x2b4   :  { %v2845_v49 = vld [vmem:[%s3669_s8 + $0x40] sm:$0xff]  }
 0x2b5   :  { %v2537_v52 = vpop.f32.mrf.mxu1 }
 0x2b6   :  { %v1365_v52 = vlaneseq }
 0x2b8   :  { %v1366_v53 = vshrl.u32 %v1365_v52, 7 }
 0x2ba   :  { %v1367_v54 = vsub.s32 0, %v1366_v53  ;;  %v1375_v55 = vsub.s32 2, %v1366_v53  ;;  %v1371_v57 = vsub.s32 1, %v1366_v53  ;;  %v1379_v59 = vsub.s32 3, %v1366_v53 }
 0x2bc   :  { %v1368_v60 = vrot.slane %v1363_v56, %v1367_v54  ;;  %v1376_v61 = vrot.slane %v1363_v56, %v1375_v55  ;;  %v1372_v62 = vrot.slane %v1363_v56, %v1371_v57  ;;  %v1380_v63 = vrot.slane %v1363_v56, %v1379_v59 }
 0x2cf   :  { %v851_v3 = vpop.f32.mrf.mxu1 }
 0x2d0   :  { %v857_v4 = vadd.f32 %v851_v3, %v707_v43  ;;  %v2838_v43 = vld [vmem:[%s3669_s8 + $0x90] sm:$0xff]   ;;  %s1933_s8 = sshll.u32 %s2895_s7, 4  ;;  %s1934_s8 = int_to_ptr.vmem [resolvable:$true] %s1933_s8 }
 0x2d1   :  { %v2576_v5 = vpop.f32.mrf.mxu1  ;;  %s2848_s4 = scalar_lea.vmem %s1934_s8, 32  ;;  %p2853_p1 = scmp.lt.s32.totalorder %s1934_s8, %s1934_s8 }
 0x2d2   :  { %p2849_p0 = scmp.ne.s32.totalorder %s1934_s8, %s2848_s4  ;;  %p2854_p2 = scmp.lt.s32.totalorder %s2848_s4, %s2848_s4 }
 0x2d3   :  { %v854_v6 = vpop.f32.mrf.mxu1 }
 0x2d4   :  { %p2855_p3 = por %p2854_p2, %p2853_p1 }
 0x2d5   :  { %v2577_v7 = vpop.f32.mrf.mxu1 }
 0x2d6   :  { %p2856_p4 = pnand %p2855_p3, %p2849_p0 }
 0x2ef   :  { %v1001_v8 = vpop.f32.mrf.mxu1 }
 0x2f0   :  { %v1007_v16 = vadd.f32 %v1001_v8, %v857_v4 }
 0x2f1   :  { %v2616_v9 = vpop.f32.mrf.mxu1 }
 0x2f3   :  { %v1004_v10 = vpop.f32.mrf.mxu1 }
 0x2f5   :  { %v2617_v11 = vpop.f32.mrf.mxu1 }
 0x30f   :  { %v1151_v12 = vpop.f32.mrf.mxu1 }
 0x310   :  { %v1157_v17 = vadd.f32 %v1151_v12, %v1007_v16 }
 0x311   :  { %v2656_v13 = vpop.f32.mrf.mxu1 }
 0x313   :  { %v1154_v14 = vpop.f32.mrf.mxu1 }
 0x315   :  { %v2657_v15 = vpop.f32.mrf.mxu1 }
 0x32f   :  { %v1301_v18 = vpop.f32.mrf.mxu1 }
 0x330   :  { %v1307_v20 = vadd.f32 %v1301_v18, %v1157_v17 }
 0x331   :  { %v2696_v21 = vpop.f32.mrf.mxu1 }
 0x332   :  { %v1315_v22 = vadd.f32 %v2151_v19, %v1307_v20 }
 0x333   :  { %v1304_v24 = vpop.f32.mrf.mxu1 }
 0x334   :  { %v1316_v25 = vmax.f32 %v1315_v22, 0.0 }
 0x335   :  { %v2697_v26 = vpop.f32.mrf.mxu1 }
 0x336   :  { %v1325_v28 = vmul.f32 %v2152_v23, %v1316_v25  ;;  %1327 = vst [vmem:[#allocation2] sm:$0x3] %v1316_v25  ;;  %1317 = vst [vmem:[#allocation3] sm:$0x3] %v1316_v25 }
 0x338   :  { %1328 = vst [vmem:[#allocation2 + $0x2] sm:$0x3] %v1325_v28  ;;  %1326 = vst [vmem:[#allocation5] sm:$0x3] %v1325_v28 }
 0x33f   :  { %v1329_v29 = vld [vmem:[#allocation2] sm:$0xf] }
 0x340   :  { %v1330_v30 = vpack.c.bf16 %v1329_v29, %v1329_v29 }
 0x342   :  { %1578 = vmatmul.mubr.bf16.vlgmr.msra.gmra.mxu0 %v1330_v30  ;;  %1619 = vmatmul.mubr.bf16.vlgmr.msra.gmra.mxu1 %v1330_v30 }
 0x343   :  { %1887 = vmatpush1.bf16.msra.mxu1 %v2823_v1  ;;  %2357 = vmatpush3.bf16.msra.mxu0 %v2825_v27 }
 0x344   :  { %1888 = vmatprep.subr.bf16.mxu1 %v2894_v0  ;;  %2358 = vmatprep.subr.bf16.mxu0 %v2827_v58 }
 0x347   :  { %1889 = vmatpush1.bf16.msra.mxu1 %v2826_v31  ;;  %2359 = vmatpush3.bf16.msra.mxu0 %v2828_v32 }
 0x348   :  { %1890 = vmatprep.subr.bf16.mxu1 %v2894_v0  ;;  %2360 = vmatprep.subr.bf16.mxu0 %v2830_v33 }
 0x34b   :  { %1891 = vmatpush1.bf16.msra.mxu1 %v2829_v34  ;;  %2361 = vmatpush3.bf16.msra.mxu0 %v2831_v35 }
 0x34c   :  { %1892 = vmatprep.subr.bf16.mxu1 %v2894_v0  ;;  %2362 = vmatprep.subr.bf16.mxu0 %v2833_v36 }
 0x34f   :  { %1893 = vmatpush1.bf16.msra.mxu1 %v2832_v37  ;;  %2363 = vmatpush3.bf16.msra.mxu0 %v2834_v38 }
 0x350   :  { %1894 = vmatprep.subr.bf16.mxu1 %v2894_v0  ;;  %2364 = vmatprep.subr.bf16.mxu0 %v2836_v39 }
 0x353   :  { %1895 = vmatpush1.bf16.msra.mxu1 %v2835_v40  ;;  %2365 = vmatpush3.bf16.msra.mxu0 %v2837_v41 }
 0x354   :  { %1896 = vmatprep.subr.bf16.mxu1 %v2894_v0  ;;  %2366 = vmatprep.subr.bf16.mxu0 %v2839_v42 }
 0x357   :  { %1897 = vmatpush1.bf16.msra.mxu1 %v2838_v43  ;;  %2367 = vmatpush3.bf16.msra.mxu0 %v2840_v44 }
 0x358   :  { %1898 = vmatprep.subr.bf16.mxu1 %v2894_v0  ;;  %2368 = vmatprep.subr.bf16.mxu0 %v2842_v46 }
 0x35b   :  { %1899 = vmatpush1.bf16.msra.mxu1 %v2841_v45  ;;  %2369 = vmatpush3.bf16.msra.mxu0 %v2843_v47 }
 0x35c   :  { %1900 = vmatprep.subr.bf16.mxu1 %v2894_v0  ;;  %2370 = vmatprep.subr.bf16.mxu0 %v2845_v49 }
 0x35f   :  { %1901 = vmatpush1.bf16.msra.mxu1 %v2844_v48  ;;  %2371 = vmatpush3.bf16.msra.mxu0 %v2846_v50 }
 0x360   :  { %1916 = vmatprep.subr.bf16.mxu1 %v2894_v0 }
 0x363   :  { %1917 = vmatpush2.bf16.msra.mxu1 %v2847_v51 }
 0x402   :  { %v1579_v0 = vpop.f32.mrf.mxu0  ;;  %v1620_v2 = vpop.f32.mrf.mxu1 }
 0x403   :  { %v1580_v3 = vadd.f32 %v1579_v0, %v1368_v60  ;;  %v1621_v4 = vadd.f32 %v1620_v2, %v1376_v61 }
 0x404   :  { %v1581_v5 = vpop.f32.mrf.mxu0  ;;  %v1622_v6 = vpop.f32.mrf.mxu1 }
 0x405   :  { %v1582_v7 = vadd.f32 %v1581_v5, %v1372_v62  ;;  %v1623_v8 = vadd.f32 %v1622_v6, %v1380_v63  ;;  %v1627_v9 = vmax.f32 %v1580_v3, 0.0  ;;  %v1629_v10 = vmax.f32 %v1621_v4, 0.0 }
 0x406   :  { %v1583_v11 = vpop.f32.mrf.mxu0  ;;  %v1624_v12 = vpop.f32.mrf.mxu1 }
 0x407   :  { %v1628_v13 = vmax.f32 %v1582_v7, 0.0  ;;  %v1630_v14 = vmax.f32 %v1623_v8, 0.0  ;;  %v1631_v19 = vpack.c.bf16 %v1627_v9, %v1627_v9  ;;  %v1633_v20 = vpack.c.bf16 %v1629_v10, %v1629_v10 }
 0x408   :  { %v1584_v15 = vpop.f32.mrf.mxu0  ;;  %v1625_v16 = vpop.f32.mrf.mxu1 }
 0x409   :  { %v1632_v17 = vpack.c.bf16 %v1628_v13, %v1628_v13  ;;  %v1634_v18 = vpack.c.bf16 %v1630_v14, %v1630_v14 }
 0x40b   :  { %1878 = vmatprep.mubr.bf16.mxu0 %v1632_v17  ;;  %2211 = vmatprep.mubr.msk.bf16.mxu1 %vm1842_vm1, %v1634_v18 }
 0x40c   :  { %1879 = vmatmul.mubr.bf16.vlgmr.msra.gmra.mxu0 %v1631_v19  ;;  %1919 = vmatmul.mubr.bf16.vlgmr.msra.gmra.mxu1 %v1633_v20 }
 0x40d   :  { %2859 = shalt.err (!%p2856_p4)
}
 0x40e   :  { %1936 = dma.vmem_to_hbm [thread:$0]  %s1934_s8, 32, %s3671_s10, [#allocation4]  }
 0x40f   :  { %s2868_s5 = scalar_lea.vmem %s1944_s1, 32  ;;  %p2873_p6 = scmp.lt.s32.totalorder %s1944_s1, %s1944_s1 }
 0x410   :  { %p2869_p5 = scmp.ne.s32.totalorder %s1944_s1, %s2868_s5  ;;  %p2874_p7 = scmp.lt.s32.totalorder %s2868_s5, %s2868_s5 }
 0x412   :  { %p2875_p8 = por %p2874_p7, %p2873_p6 }
 0x414   :  { %p2876_p9 = pnand %p2875_p8, %p2869_p5 }
 0x416   :  { %2879 = shalt.err (!%p2876_p9)
}
 0x417   :  { %1946 = dma.vmem_to_hbm [thread:$0]  %s1944_s1, 32, %s3672_s11, [#allocation6]   ;;  %v2185_v23 = vld [vmem:[%s3670_s9] ss:$0 sm:$0xff] }
 0x4cc   :  { %v2372_v21 = vpop.f32.mrf.mxu0  ;;  %v1920_v22 = vpop.f32.mrf.mxu1 }
 0x4ce   :  { %v2373_v24 = vpop.f32.mrf.mxu0  ;;  %v1922_v25 = vpop.f32.mrf.mxu1 }
 0x4cf   :  { %v2374_v26 = vadd.f32 %v2373_v24, %v2372_v21 }
 0x4d0   :  { %v2375_v28 = vpop.f32.mrf.mxu0  ;;  %v1923_v29 = vpop.f32.mrf.mxu1 }
 0x4d1   :  { %v1881_v1 = vadd.f32 %v2374_v26, %v2185_v23 }
 0x4d2   :  { %v2376_v27 = vpop.f32.mrf.mxu0  ;;  %v1924_v30 = vpop.f32.mrf.mxu1 }
 0x4d3   :  { %v1921_v58 = vadd.f32 %v1920_v22, %v1881_v1 }
 0x4d5   :  { %1926 = vst [vmem:[%s3673_s12] sm:$0xf] %v1921_v58 }
 0x4d6   :  { %2888 = dma.done.wait [#allocation4], 32  }
 0x4d7   :  { %2889 = vsyncadd [#allocation4], 4294967264 }
 0x4d8   :  { %2890 = dma.done.wait [#allocation6], 32  }
 0x4d9   :  { %2891 = vsyncadd [#allocation6], 4294967264 }
 0x4da   :  { %1957 = vsyncpa [#allocation4], 1 }
 0x4db   :  { %1958 = vsyncpa [#allocation6], 1 }

</bundles_post_ra>
